<compile_context>
chip_gen: v7x
topology: tpu7x:2x2x1
jax: 0.10.0
libtpu: 0.0.40
codegen_flags: <defaults>
</compile_context>

<pallas_src>
import jax
import jax.numpy as jnp
import numpy as np
from jax.experimental import pallas as pl
from jax.experimental.pallas import tpu as pltpu


def _round_up(x, m):
    return (x + m - 1) // m * m


def _make_trigram_kernel(tb, context_size, embedding_dim, vocab, h_pad):
    C, E, V, H_pad = context_size, embedding_dim, vocab, h_pad

    def kernel(ids_ref, emb_ref, w1_ref, b1_ref, w2_ref, b2_ref, o_ref):
        # ids_ref : (TB, C)        i32  VMEM block (advances with batch)
        # emb_ref : (V, E)         f32  VMEM, resident across grid
        # w1_ref  : (C*E, H_pad)        VMEM, resident (H zero padded)
        # b1_ref  : (1, H_pad)     f32  VMEM, resident (H zero padded)
        # w2_ref  : (H_pad, V)          VMEM, resident (padded rows are zero)
        # b2_ref  : (1, V)         f32  VMEM, resident
        # o_ref   : (TB, V)        f32  output block -> log-probabilities
        ids = ids_ref[...]                                        # (TB, C) i32
        col = jax.lax.broadcasted_iota(jnp.int32, (tb, V), 1)     # (TB, V)

        # Fused embedding gather + Linear1 contraction, one context position at
        # a time: onehot (TB,V) @ emb (V,E) -> x_c (TB,E); x_c @ w1_c (E,H_pad).
        acc = None
        for c in range(C):  # C is tiny (2) - static unroll, all MXU work
            onehot = (col == ids[:, c:c + 1]).astype(jnp.float32)
            x_c = jnp.dot(onehot, emb_ref[...],
                          preferred_element_type=jnp.float32)     # (TB, E)
            w1_c = w1_ref[c * E:(c + 1) * E, :]                   # static slice
            contrib = jnp.dot(x_c.astype(w1_c.dtype), w1_c,
                              preferred_element_type=jnp.float32)  # (TB, H_pad)
            acc = contrib if acc is None else acc + contrib

        # tanh (EUP) + Linear2 (MXU).
        h = jnp.tanh(acc + b1_ref[...])
        logits = (jnp.dot(h.astype(w2_ref.dtype), w2_ref[...],
                          preferred_element_type=jnp.float32)
                  + b2_ref[...])                                   # (TB, V)

        # Numerically stable log_softmax over the (unpadded) vocab axis.
        m = jnp.max(logits, axis=-1, keepdims=True)
        shifted = logits - m
        lse = jnp.log(jnp.sum(jnp.exp(shifted), axis=-1, keepdims=True))
        o_ref[...] = shifted - lse

    return kernel


def pad_params(embedding_table, w1, b1, w2, b2, *, weight_dtype=jnp.float32):
    """One-time parameter preparation (call at model init, outside the forward).

    Weights are stored transposed vs. torch: w1 (C*E, H), w2 (H, V).
    Pads the hidden dim to a multiple of 128 (lane-dense matmul N/K dims); the
    vocab dim is NOT padded so log_softmax stays exact.
    """
    K, H = w1.shape
    vocab = w2.shape[1]
    H_pad = _round_up(H, 128)
    w1p = jnp.zeros((K, H_pad), weight_dtype).at[:, :H].set(w1.astype(weight_dtype))
    b1p = jnp.zeros((1, H_pad), jnp.float32).at[:, :H].set(
        b1.reshape(1, H).astype(jnp.float32))
    w2p = jnp.zeros((H_pad, vocab), weight_dtype).at[:H, :].set(w2.astype(weight_dtype))
    b2p = b2.reshape(1, vocab).astype(jnp.float32)
    embp = embedding_table.astype(jnp.float32)
    return embp, w1p, b1p, w2p, b2p


def trigram_forward(inputs, emb, w1p, b1p, w2p, b2p,
                    context_size, embedding_dim, *, block_batch=128):
    """TrigramModel forward. inputs: (B, context_size) int32 token ids.

    emb/w1p/b1p/w2p/b2p must come from pad_params().
    """
    B, C = inputs.shape
    assert C == context_size
    E = embedding_dim
    V, E_tab = emb.shape
    assert E_tab == E
    H_pad = w1p.shape[1]
    vocab = w2p.shape[1]

    TB = _round_up(block_batch, 8)          # MXU M tile (128 fills v5e MXU)
    B_pad = _round_up(B, TB)
    nb = B_pad // TB

    # Clip ids (VMEM reads are unchecked) and pad the batch to a TB multiple.
    ids = jnp.clip(inputs.astype(jnp.int32), 0, V - 1)
    ids = jnp.zeros((B_pad, C), jnp.int32).at[:B, :].set(ids)

    kernel = _make_trigram_kernel(TB, C, E, vocab, H_pad)

    wbytes = np.dtype(w1p.dtype).itemsize
    cost = pl.CostEstimate(
        flops=2 * B_pad * (C * V * E + C * E * H_pad + H_pad * vocab),
        transcendentals=B_pad * (H_pad + vocab),            # tanh + exp
        bytes_accessed=(B_pad * C * 4 + V * E * 4
                        + C * E * H_pad * wbytes + H_pad * 4
                        + H_pad * vocab * wbytes + vocab * 4
                        + B_pad * vocab * 4),
    )

    grid_spec = pltpu.PrefetchScalarGridSpec(
        num_scalar_prefetch=0,
        grid=(nb,),
        in_specs=[
            pl.BlockSpec((TB, C), lambda i: (i, 0)),           # token ids
            pl.BlockSpec((V, E), lambda i: (0, 0)),            # embedding table
            pl.BlockSpec((C * E, H_pad), lambda i: (0, 0)),    # w1 (resident)
            pl.BlockSpec((1, H_pad), lambda i: (0, 0)),        # b1
            pl.BlockSpec((H_pad, vocab), lambda i: (0, 0)),    # w2 (resident)
            pl.BlockSpec((1, vocab), lambda i: (0, 0)),        # b2
        ],
        out_specs=pl.BlockSpec((TB, vocab), lambda i: (i, 0)),
    )

    out = pl.pallas_call(
        kernel,
        grid_spec=grid_spec,
        out_shape=jax.ShapeDtypeStruct((B_pad, vocab), jnp.float32),
        compiler_params=pltpu.CompilerParams(
            dimension_semantics=("parallel",),   # v7x: shard batch over 2 TCs
        ),
        cost_estimate=cost,
    )(ids, emb, w1p, b1p, w2p, b2p)

    return out[:B]


def reference_forward(inputs, embedding_table, w1, b1, w2, b2,
                      context_size, embedding_dim):
    B = inputs.shape[0]
    embeds = jnp.take(embedding_table, inputs, axis=0).reshape(
        B, context_size * embedding_dim)
    h = jnp.tanh(embeds @ w1 + b1)
    logits = h @ w2 + b2
    return jax.nn.log_softmax(logits, axis=1)


if __name__ == "__main__":
    # Small shapes consistent with the module's forward.
    vocab_size = 256
    embedding_dim = 32
    context_size = 2       # trigram model: 2 context words
    hidden = 64
    batch = 256            # TB=128 -> 2 grid steps (megacore-splittable)

    key = jax.random.PRNGKey(0)
    k_emb, k_w1, k_b1, k_w2, k_b2, k_inp = jax.random.split(key, 6)

    embedding_table = jax.random.normal(k_emb, (vocab_size, embedding_dim), jnp.float32)
    # Linear weights stored transposed: (in_features, out_features).
    w1 = jax.random.normal(k_w1, (context_size * embedding_dim, hidden), jnp.float32) * 0.1
    b1 = jax.random.normal(k_b1, (hidden,), jnp.float32) * 0.1
    w2 = jax.random.normal(k_w2, (hidden, vocab_size), jnp.float32) * 0.1
    b2 = jax.random.normal(k_b2, (vocab_size,), jnp.float32) * 0.1

    inputs = jax.random.randint(k_inp, (batch, context_size), 0, vocab_size, jnp.int32)

    # Pad/cast params once (outside the per-call forward path).
    emb_p, w1_p, b1_p, w2_p, b2_p = pad_params(embedding_table, w1, b1, w2, b2)

    fwd = jax.jit(trigram_forward, static_argnums=(6, 7))
    log_probs = fwd(inputs, emb_p, w1_p, b1_p, w2_p, b2_p,
                    context_size, embedding_dim)
    log_probs = jax.block_until_ready(log_probs)

    ref = reference_forward(inputs, embedding_table, w1, b1, w2, b2,
                            context_size, embedding_dim)
    assert log_probs.shape == (batch, vocab_size)
    assert jnp.allclose(log_probs, ref, atol=1e-4, rtol=1e-4), "mismatch vs reference"

    print("KERNEL_OK")
</pallas_src>

<mosaic_0001>
module attributes {stable_mosaic.version = 11 : i64} {
  func.func @kernel(%arg0: i32, %arg1: memref<128x2xi32, #tpu.memory_space<vmem>>, %arg2: memref<256x32xf32, #tpu.memory_space<vmem>>, %arg3: memref<64x128xf32, #tpu.memory_space<vmem>>, %arg4: memref<1x128xf32, #tpu.memory_space<vmem>>, %arg5: memref<128x256xf32, #tpu.memory_space<vmem>>, %arg6: memref<1x256xf32, #tpu.memory_space<vmem>>, %arg7: memref<128x256xf32, #tpu.memory_space<vmem>>) attributes {dimension_semantics = [#tpu.dimension_semantics<parallel>], iteration_bounds = array<i64: 2>, scalar_prefetch = 0 : i64, scratch_operands = 0 : i64, tpu.core_type = #tpu.core_type<tc>, window_params = [{transform_indices = @transform_0, window_bounds = array<i64: 128, 2>}, {pipeline_mode = #tpu.pipeline_mode<synchronous>, transform_indices = @transform_1, window_bounds = array<i64: 256, 32>}, {pipeline_mode = #tpu.pipeline_mode<synchronous>, transform_indices = @transform_2, window_bounds = array<i64: 64, 128>}, {pipeline_mode = #tpu.pipeline_mode<synchronous>, transform_indices = @transform_3, window_bounds = array<i64: 1, 128>}, {pipeline_mode = #tpu.pipeline_mode<synchronous>, transform_indices = @transform_4, window_bounds = array<i64: 128, 256>}, {pipeline_mode = #tpu.pipeline_mode<synchronous>, transform_indices = @transform_5, window_bounds = array<i64: 1, 256>}, {transform_indices = @transform_6, window_bounds = array<i64: 128, 256>}]} {
    %c0 = arith.constant 0 : index
    %c0_0 = arith.constant 0 : index
    %0 = vector.load %arg1[%c0, %c0_0] : memref<128x2xi32, #tpu.memory_space<vmem>>, vector<128x2xi32>
    %1 = tpu.iota {dimensions = array<i32: 1>} : vector<128x256xi32>
    %2 = vector.extract_strided_slice %0 {offsets = [0, 0], sizes = [128, 1], strides = [1, 1]} : vector<128x2xi32> to vector<128x1xi32>
    %3 = vector.broadcast %2 : vector<128x1xi32> to vector<128x256xi32>
    %4 = arith.cmpi eq, %1, %3 : vector<128x256xi32>
    %5 = arith.extui %4 : vector<128x256xi1> to vector<128x256xi32>
    %6 = arith.sitofp %5 : vector<128x256xi32> to vector<128x256xf32>
    %c0_1 = arith.constant 0 : index
    %c0_2 = arith.constant 0 : index
    %7 = vector.load %arg2[%c0_1, %c0_2] : memref<256x32xf32, #tpu.memory_space<vmem>>, vector<256x32xf32>
    %cst = arith.constant dense<0.000000e+00> : vector<128x32xf32>
    %8 = tpu.matmul %6, %7, %cst {dimension_numbers = #tpu.dot_dimension_numbers<[1], [0], [0], [1], [0, 0, 1, 1], [], []>} : vector<128x256xf32>, vector<256x32xf32>, vector<128x32xf32> -> vector<128x32xf32>
    %c0_3 = arith.constant 0 : index
    %c0_4 = arith.constant 0 : index
    %9 = vector.load %arg3[%c0_3, %c0_4] : memref<64x128xf32, #tpu.memory_space<vmem>>, vector<32x128xf32>
    %cst_5 = arith.constant dense<0.000000e+00> : vector<128x128xf32>
    %10 = tpu.matmul %8, %9, %cst_5 {dimension_numbers = #tpu.dot_dimension_numbers<[1], [0], [0], [1], [0, 0, 1, 1], [], []>} : vector<128x32xf32>, vector<32x128xf32>, vector<128x128xf32> -> vector<128x128xf32>
    %11 = vector.extract_strided_slice %0 {offsets = [0, 1], sizes = [128, 1], strides = [1, 1]} : vector<128x2xi32> to vector<128x1xi32>
    %12 = vector.broadcast %11 : vector<128x1xi32> to vector<128x256xi32>
    %13 = arith.cmpi eq, %1, %12 : vector<128x256xi32>
    %14 = arith.extui %13 : vector<128x256xi1> to vector<128x256xi32>
    %15 = arith.sitofp %14 : vector<128x256xi32> to vector<128x256xf32>
    %c0_6 = arith.constant 0 : index
    %c0_7 = arith.constant 0 : index
    %16 = vector.load %arg2[%c0_6, %c0_7] : memref<256x32xf32, #tpu.memory_space<vmem>>, vector<256x32xf32>
    %cst_8 = arith.constant dense<0.000000e+00> : vector<128x32xf32>
    %17 = tpu.matmul %15, %16, %cst_8 {dimension_numbers = #tpu.dot_dimension_numbers<[1], [0], [0], [1], [0, 0, 1, 1], [], []>} : vector<128x256xf32>, vector<256x32xf32>, vector<128x32xf32> -> vector<128x32xf32>
    %c32 = arith.constant 32 : index
    %c0_9 = arith.constant 0 : index
    %18 = vector.load %arg3[%c32, %c0_9] : memref<64x128xf32, #tpu.memory_space<vmem>>, vector<32x128xf32>
    %cst_10 = arith.constant dense<0.000000e+00> : vector<128x128xf32>
    %19 = tpu.matmul %17, %18, %cst_10 {dimension_numbers = #tpu.dot_dimension_numbers<[1], [0], [0], [1], [0, 0, 1, 1], [], []>} : vector<128x32xf32>, vector<32x128xf32>, vector<128x128xf32> -> vector<128x128xf32>
    %20 = arith.addf %10, %19 : vector<128x128xf32>
    %c0_11 = arith.constant 0 : index
    %c0_12 = arith.constant 0 : index
    %21 = vector.load %arg4[%c0_11, %c0_12] : memref<1x128xf32, #tpu.memory_space<vmem>>, vector<1x128xf32>
    %22 = vector.broadcast %21 : vector<1x128xf32> to vector<128x128xf32>
    %23 = arith.addf %20, %22 : vector<128x128xf32>
    %24 = math.tanh %23 : vector<128x128xf32>
    %c0_13 = arith.constant 0 : index
    %c0_14 = arith.constant 0 : index
    %25 = vector.load %arg5[%c0_13, %c0_14] : memref<128x256xf32, #tpu.memory_space<vmem>>, vector<128x256xf32>
    %cst_15 = arith.constant dense<0.000000e+00> : vector<128x256xf32>
    %26 = tpu.matmul %24, %25, %cst_15 {dimension_numbers = #tpu.dot_dimension_numbers<[1], [0], [0], [1], [0, 0, 1, 1], [], []>} : vector<128x128xf32>, vector<128x256xf32>, vector<128x256xf32> -> vector<128x256xf32>
    %c0_16 = arith.constant 0 : index
    %c0_17 = arith.constant 0 : index
    %27 = vector.load %arg6[%c0_16, %c0_17] : memref<1x256xf32, #tpu.memory_space<vmem>>, vector<1x256xf32>
    %28 = vector.broadcast %27 : vector<1x256xf32> to vector<128x256xf32>
    %29 = arith.addf %26, %28 : vector<128x256xf32>
    %cst_18 = arith.constant dense<0xFF800000> : vector<128xf32>
    %30 = vector.multi_reduction <maximumf>, %29, %cst_18 [1] : vector<128x256xf32> to vector<128xf32>
    %31 = vector.shape_cast %30 : vector<128xf32> to vector<128x1xf32>
    %32 = vector.broadcast %31 : vector<128x1xf32> to vector<128x256xf32>
    %33 = arith.subf %29, %32 : vector<128x256xf32>
    %34 = math.exp %33 : vector<128x256xf32>
    %cst_19 = arith.constant dense<0.000000e+00> : vector<128xf32>
    %35 = vector.multi_reduction <add>, %34, %cst_19 [1] : vector<128x256xf32> to vector<128xf32>
    %36 = vector.shape_cast %35 : vector<128xf32> to vector<128x1xf32>
    %37 = math.log %36 : vector<128x1xf32>
    %38 = vector.broadcast %37 : vector<128x1xf32> to vector<128x256xf32>
    %39 = arith.subf %33, %38 : vector<128x256xf32>
    %c0_20 = arith.constant 0 : index
    %c0_21 = arith.constant 0 : index
    %40 = vector.load %arg7[%c0_20, %c0_21] : memref<128x256xf32, #tpu.memory_space<vmem>>, vector<128x256xf32>
    tpu.vector_store %arg7[%c0_20, %c0_21], %39 {strides = array<i32>} : memref<128x256xf32, #tpu.memory_space<vmem>>, vector<128x256xf32>,
    return
  }
  func.func @transform_0(%arg0: i32) -> (i32, i32) {
    %c0_i32 = arith.constant 0 : i32
    %c0_i32_0 = arith.constant 0 : i32
    return %arg0, %c0_i32 : i32, i32
  }
  func.func @transform_1(%arg0: i32) -> (i32, i32) {
    %c0_i32 = arith.constant 0 : i32
    %c0_i32_0 = arith.constant 0 : i32
    %c0_i32_1 = arith.constant 0 : i32
    return %c0_i32, %c0_i32_0 : i32, i32
  }
  func.func @transform_2(%arg0: i32) -> (i32, i32) {
    %c0_i32 = arith.constant 0 : i32
    %c0_i32_0 = arith.constant 0 : i32
    %c0_i32_1 = arith.constant 0 : i32
    return %c0_i32, %c0_i32_0 : i32, i32
  }
  func.func @transform_3(%arg0: i32) -> (i32, i32) {
    %c0_i32 = arith.constant 0 : i32
    %c0_i32_0 = arith.constant 0 : i32
    %c0_i32_1 = arith.constant 0 : i32
    return %c0_i32, %c0_i32_0 : i32, i32
  }
  func.func @transform_4(%arg0: i32) -> (i32, i32) {
    %c0_i32 = arith.constant 0 : i32
    %c0_i32_0 = arith.constant 0 : i32
    %c0_i32_1 = arith.constant 0 : i32
    return %c0_i32, %c0_i32_0 : i32, i32
  }
  func.func @transform_5(%arg0: i32) -> (i32, i32) {
    %c0_i32 = arith.constant 0 : i32
    %c0_i32_0 = arith.constant 0 : i32
    %c0_i32_1 = arith.constant 0 : i32
    return %c0_i32, %c0_i32_0 : i32, i32
  }
  func.func @transform_6(%arg0: i32) -> (i32, i32) {
    %c0_i32 = arith.constant 0 : i32
    %c0_i32_0 = arith.constant 0 : i32
    return %arg0, %c0_i32 : i32, i32
  }
}

</mosaic_0001>

<bundles_post_ra>
// kernel: trigram_forward.1
= control target key start
LH: loop header
LB: loop body
LE: loop exit
PB: predicated region body
PF: predicated region fallthrough
CT: control target
= control target key end

     0   :  { %11 = vsyncpa [#allocation3], 0  ;;  %s3659_s0 = inlined_call_operand.vmem [shape: s32[256,2], index: 0, kind: input, shape index: {}]   ;;  %s3660_s1 = inlined_call_operand.vmem [shape: f32[256,32], index: 1, kind: input, shape index: {}]   ;;  %s3661_s2 = inlined_call_operand.vmem [shape: f32[64,128], index: 2, kind: input, shape index: {}]   ;;  %s3662_s3 = inlined_call_operand.vmem [shape: f32[1,128], index: 3, kind: input, shape index: {}]   ;;  %s3663_s4 = inlined_call_operand.vmem [shape: f32[128,256], index: 4, kind: input, shape index: {}]   ;;  %s3664_s5 = inlined_call_operand.vmem [shape: f32[1,256], index: 5, kind: input, shape index: {}]   ;;  %s3665_s6 = inlined_call_operand.hbm [shape: f32[256,256], index: 6, kind: output, shape index: {}]  }
   0x1   :  { %13 = vsyncpa [#allocation3 + $0x1], 0  ;;  %s2738_s21 = smov 0   ;;  %s2740_s22 = smov 0  }
   0x2   :  { %s2742_s23 = smov 0   ;;  %s2744_s24 = smov 0  }
   0x3 LB: > { %s2759_s25 = sadd.s32 4294967295, %s2694_s24   ;;  %s1886_s26 = sadd.s32 4294967294, %s2694_s24   ;;  %s2694_s24 = sphi %s2744_s24, %s3671_s24   ;;  %s2690_s23 = sphi %s2742_s23, %s3670_s23   ;;  %s2686_s22 = sphi %s2740_s22, %s3669_s22   ;;  %s2682_s21 = sphi %s2738_s21, %s3668_s21  }
   0x4   : > { %s2763_s27 = sadd.s32 1, %s2694_s24   ;;  %s157_s28 = sadd.s32 1, %s2690_s23 }
   0x5   : > { %s154_s29 = ssub.s32 %s2694_s24, %s2763_s27  ;;  %p167_p0 = scmp.ne.s32.totalorder %s2690_s23, %s2686_s22 }
   0x6   : > { %p155_p1 = scmp.eq.s32.totalorder %s154_s29, 0  ;;  %p168_p2 = scmp.eq.s32.totalorder %s2759_s25, 1 }
   0x7   : > { %p173_p3 = scmp.ne.s32.totalorder %s2686_s22, %s2682_s21  ;;  %p174_p4 = scmp.eq.s32.totalorder %s1886_s26, 1 }
   0x8   : > { %s2774_s30 = scalar_select %p155_p1, %s2690_s23, %s157_s28  }
   0x9   : > { %p2776_p5 = por %p168_p2, %p167_p0  ;;  %p2780_p6 = por %p174_p4, %p173_p3 }
   0xa   : > { %p1889_p7 = scmp.ge.s32.totalorder %s2694_s24, 1  ;;  %p216_p8 = scmp.lt.s32.totalorder %s2694_s24, 3 }
   0xc   : > { %p217_p9 = pnand %p1889_p7, %p216_p8 }
   0xd   : > { %s1891_s9 = sshll.u32 (!%p217_p9), %s2759_s25, 4  ;;  %v432_v0 = vld [vmem:[%s3660_s1 + $0x80] sm:$0xff] (!%p217_p9)  ;;  %v433_v1 = vld [vmem:[%s3660_s1 + $0x88] sm:$0xff] (!%p217_p9)  ;;  %v2696_v3 = vmov (!%p217_p9), 1   ;;  %v434_v6 = vld [vmem:[%s3660_s1 + $0x90] sm:$0xff] (!%p217_p9)  ;;  %s243_s15 = sand.u32 (!%p217_p9), 1, %s2686_s22  }
   0xe   : > { %220 = sbr.rel (%p217_p9) target bundleno = 1269 (0x4f5), region = 44  ;;  %v416_v2 = vld [vmem:[%s3660_s1] sm:$0xff] (!%p217_p9)  ;;  %2500 = vset.pattern.permute.xlu1 (!%p217_p9), %v2696_v3  ;;  %2499 = vset.pattern.permute.xlu0 (!%p217_p9), %v2696_v3  ;;  %p247_p10 = scmp.lt.s32.totalorder (!%p217_p9), %s1891_s9, 31  ;;  %v2326_v4 = vpack.c.bf16 (!%p217_p9), %v433_v1, %v432_v0  ;;  %v417_v5 = vld [vmem:[%s3660_s1 + $0x8] sm:$0xff] (!%p217_p9)  ;;  %v435_v7 = vld [vmem:[%s3660_s1 + $0x98] sm:$0xff] (!%p217_p9)  ;;  %v2697_v0 = vmov (!%p217_p9), 0  }
   0xf   : > { %v2328_v8 = vpack.c.bf16 (!%p217_p9), %v417_v5, %v416_v2  ;;  %v2330_v9 = vpack.c.bf16 (!%p217_p9), %v435_v7, %v434_v6  ;;  %v418_v10 = vld [vmem:[%s3660_s1 + $0x10] sm:$0xff] (!%p217_p9)  ;;  %v419_v11 = vld [vmem:[%s3660_s1 + $0x18] sm:$0xff] (!%p217_p9)  ;;  %v436_v12 = vld [vmem:[%s3660_s1 + $0xa0] sm:$0xff] (!%p217_p9)  ;;  %v269_v6 = vlaneseq (!%p217_p9)  ;;  %s2061_s18 = sshll.u32 (!%p217_p9), %s2759_s25, 12  ;;  %s3618_s25 = scalar_lea.sflag (!%p217_p9), [#allocation3], %s243_s15 }
  0x10   : > { %2359 = vmatprep.subr.bf16.mxu1 (!%p217_p9), %v2326_v4  ;;  %v437_v13 = vld [vmem:[%s3660_s1 + $0xa8] sm:$0xff] (!%p217_p9)  ;;  %2327 = vmatprep.subr.bf16.mxu0 (!%p217_p9), %v2326_v4  ;;  %v2332_v14 = vpack.c.bf16 (!%p217_p9), %v419_v11, %v418_v10  ;;  %v420_v16 = vld [vmem:[%s3660_s1 + $0x20] sm:$0xff] (!%p217_p9)  ;;  %v438_v18 = vld [vmem:[%s3660_s1 + $0xb0] sm:$0xff] (!%p217_p9)  ;;  %s3608_s28 = scalar_lea.hbm (!%p217_p9), %s3665_s6, %s2061_s18 }
  0x11   : > { %2361 = vmatpush3.bf16.msra.mxu1 (!%p217_p9), %v2328_v8  ;;  %2329 = vmatpush3.bf16.msra.mxu0 (!%p217_p9), %v2328_v8  ;;  %v2334_v15 = vpack.c.bf16 (!%p217_p9), %v437_v13, %v436_v12  ;;  %v421_v17 = vld [vmem:[%s3660_s1 + $0x28] sm:$0xff] (!%p217_p9)  ;;  %v439_v21 = vld [vmem:[%s3660_s1 + $0xb8] sm:$0xff] (!%p217_p9)  ;;  %v422_v26 = vld [vmem:[%s3660_s1 + $0x30] sm:$0xff] (!%p217_p9)  ;;  %v2942_v7 = vand.u32 (!%p217_p9), 127, %v269_v6 }
  0x12   : > { %2363 = vmatprep.subr.bf16.mxu1 (!%p217_p9), %v2330_v9  ;;  %2331 = vmatprep.subr.bf16.mxu0 (!%p217_p9), %v2330_v9  ;;  %v2336_v24 = vpack.c.bf16 (!%p217_p9), %v421_v17, %v420_v16  ;;  %v2338_v25 = vpack.c.bf16 (!%p217_p9), %v439_v21, %v438_v18  ;;  %v423_v27 = vld [vmem:[%s3660_s1 + $0x38] sm:$0xff] (!%p217_p9)  ;;  %v440_v28 = vld [vmem:[%s3660_s1 + $0xc0] sm:$0xff] (!%p217_p9)  ;;  %v441_v29 = vld [vmem:[%s3660_s1 + $0xc8] sm:$0xff] (!%p217_p9) }
  0x13   : > { %v2340_v32 = vpack.c.bf16 (!%p217_p9), %v423_v27, %v422_v26  ;;  %v2342_v33 = vpack.c.bf16 (!%p217_p9), %v441_v29, %v440_v28  ;;  %v424_v34 = vld [vmem:[%s3660_s1 + $0x40] sm:$0xff] (!%p217_p9)  ;;  %v425_v35 = vld [vmem:[%s3660_s1 + $0x48] sm:$0xff] (!%p217_p9)  ;;  %v442_v36 = vld [vmem:[%s3660_s1 + $0xd0] sm:$0xff] (!%p217_p9)  ;;  %v2945_v8 = vadd.s32 (!%p217_p9), 128, %v2942_v7 }
  0x14   : > { %v443_v37 = vld [vmem:[%s3660_s1 + $0xd8] sm:$0xff] (!%p217_p9)  ;;  %v2344_v40 = vpack.c.bf16 (!%p217_p9), %v425_v35, %v424_v34  ;;  %v426_v42 = vld [vmem:[%s3660_s1 + $0x50] sm:$0xff] (!%p217_p9)  ;;  %v444_v44 = vld [vmem:[%s3660_s1 + $0xe0] sm:$0xff] (!%p217_p9) }
  0x15   : > { %s3673_s9 = smov (!%p247_p10, %s1891_s9), 31  ;;  %2365 = vmatpush3.bf16.msra.mxu1 %v2332_v14  ;;  %2333 = vmatpush3.bf16.msra.mxu0 %v2332_v14  ;;  %v2346_v41 = vpack.c.bf16 %v443_v37, %v442_v36  ;;  %v427_v43 = vld [vmem:[%s3660_s1 + $0x58] sm:$0xff]  ;;  %v445_v45 = vld [vmem:[%s3660_s1 + $0xe8] sm:$0xff]  ;;  %v428_v50 = vld [vmem:[%s3660_s1 + $0x60] sm:$0xff] }
  0x16   : > { %s1892_s16 = sshll.u32 %s3673_s9, 3  ;;  %2367 = vmatprep.subr.bf16.mxu1 %v2334_v15  ;;  %2335 = vmatprep.subr.bf16.mxu0 %v2334_v15  ;;  %v2348_v48 = vpack.c.bf16 %v427_v43, %v426_v42  ;;  %v2350_v49 = vpack.c.bf16 %v445_v45, %v444_v44  ;;  %v429_v51 = vld [vmem:[%s3660_s1 + $0x68] sm:$0xff]  ;;  %v446_v52 = vld [vmem:[%s3660_s1 + $0xf0] sm:$0xff]  ;;  %v447_v53 = vld [vmem:[%s3660_s1 + $0xf8] sm:$0xff]  ;;  %s2700_s9 = smov [#allocation2]  }
  0x17   : > { %s2822_s19 = scalar_lea.vmem %s3659_s0, %s1892_s16  ;;  %v2352_v56 = vpack.c.bf16 %v429_v51, %v428_v50  ;;  %v2354_v57 = vpack.c.bf16 %v447_v53, %v446_v52  ;;  %v430_v58 = vld [vmem:[%s3660_s1 + $0x70] sm:$0xff]  ;;  %v431_v59 = vld [vmem:[%s3660_s1 + $0x78] sm:$0xff]  ;;  %v886_v2 = vld [vmem:[%s3661_s2 + $0x20] sm:$0xff]  ;;  %s1890_s16 = sshll.u32 %s243_s15, 8 }
  0x18   : > { %v2834_v19 = vld [vmem:[%s2822_s19 + $0x10] sm:$0xff]  ;;  %v2837_v20 = vld [vmem:[%s2822_s19] sm:$0xff]  ;;  %v2845_v22 = vld [vmem:[%s2822_s19 + $0x18] sm:$0xff]  ;;  %v2356_v62 = vpack.c.bf16 %v431_v59, %v430_v58  ;;  %s3543_s17 = scalar_lea.vmem [#allocation2], %s1890_s16  ;;  %s2636_s10 = sshll.u32 %s2700_s9, 4  ;;  %s2637_s10 = int_to_ptr.vmem [resolvable:$false] %s2636_s10 }
  0x19   : > { %604 = vperm.xlu1 %2500, %v2834_v19   ;;  %598 = vperm.xlu0 %2499, %v2837_v20   ;;  %v2848_v23 = vld [vmem:[%s2822_s19 + $0x8] sm:$0xff]  ;;  %v2868_v31 = vld [vmem:[%s2822_s19 + $0x20] sm:$0xff]  ;;  %v2885_v38 = vld [vmem:[%s2822_s19 + $0x38] sm:$0xff]  ;;  %s1824_s20 = sshll.u32 %s3543_s17, 4  ;;  %s2638_s11 = scalar_lea.vmem %s2637_s10, 8192  ;;  %s3610_s20 = int_to_ptr.vmem [resolvable:$true] %s1824_s20 }
  0x1a   : > { %v2865_v30 = vld [vmem:[%s2822_s19 + $0x28] sm:$0xff]  ;;  %2369 = vmatpush3.bf16.msra.mxu1 %v2336_v24  ;;  %2337 = vmatpush3.bf16.msra.mxu0 %v2336_v24  ;;  %v259_v39 = vld [vmem:[%s2822_s19 + $0x30] sm:$0xff]  ;;  %v261_v47 = vld [vmem:[%s2822_s19 + $0x40] sm:$0xff]  ;;  %s2632_s29 = scalar_lea.vmem %s3610_s20, 4096  ;;  %p2639_p0 = scmp.lt.s32.totalorder %s3610_s20, %s2637_s10 }
  0x1b   : > { %2371 = vmatprep.subr.bf16.mxu1 %v2338_v25  ;;  %2339 = vmatprep.subr.bf16.mxu0 %v2338_v25  ;;  %v262_v46 = vld [vmem:[%s2822_s19 + $0x48] sm:$0xff]  ;;  %v264_v54 = vld [vmem:[%s2822_s19 + $0x58] sm:$0xff]  ;;  %v263_v55 = vld [vmem:[%s2822_s19 + $0x50] sm:$0xff]  ;;  %p2633_p11 = scmp.ne.s32.totalorder %s3610_s20, %s2632_s29  ;;  %p2640_p1 = scmp.lt.s32.totalorder %s2638_s11, %s2632_s29 }
  0x1c   : > { %v266_v60 = vld [vmem:[%s2822_s19 + $0x68] sm:$0xff]  ;;  %v265_v61 = vld [vmem:[%s2822_s19 + $0x60] sm:$0xff]  ;;  %v267_v63 = vld [vmem:[%s2822_s19 + $0x70] sm:$0xff] }
  0x1d   : > { %607 = vperm.xlu1 %2500, %v2845_v22   ;;  %601 = vperm.xlu0 %2499, %v2848_v23   ;;  %v268_v1 = vld [vmem:[%s2822_s19 + $0x78] sm:$0xff]  ;;  %v887_v4 = vld [vmem:[%s3661_s2 + $0x28] sm:$0xff]  ;;  %v593_v44 = vld [vmem:[%s3661_s2] sm:$0xff]  ;;  %p2634_p12 = pnand %p2633_p11, %p2776_p5  ;;  %p2641_p2 = por %p2640_p1, %p2639_p0 }
  0x1e   : > { %2373 = vmatpush3.bf16.msra.mxu1 %v2340_v32  ;;  %2341 = vmatpush3.bf16.msra.mxu0 %v2340_v32  ;;  %v2390_v5 = vpack.c.bf16 %v887_v4, %v886_v2  ;;  %v889_v42 = vld [vmem:[%s3661_s2 + $0x38] sm:$0xff]  ;;  %v594_v45 = vld [vmem:[%s3661_s2 + $0x8] sm:$0xff]  ;;  %v1318_v51 = vld [vmem:[%s3663_s4 + $0x10] sm:$0xff] }
  0x1f   : > { %2375 = vmatprep.subr.bf16.mxu1 %v2342_v33  ;;  %2343 = vmatprep.subr.bf16.mxu0 %v2342_v33  ;;  %v1321_v52 = vld [vmem:[%s3663_s4 + $0x28] sm:$0xff]  ;;  %v1323_v53 = vld [vmem:[%s3663_s4 + $0x38] sm:$0xff]  ;;  %p2635_p13 = pneg %p2634_p12 }
  0x20   : > { %v1325_v58 = vld [vmem:[%s3663_s4 + $0x48] sm:$0xff]  ;;  %v1327_v59 = vld [vmem:[%s3663_s4 + $0x58] sm:$0xff] }
  0x21   : > { %613 = vperm.xlu1 %2500, %v2865_v30   ;;  %610 = vperm.xlu0 %2499, %v2868_v31   ;;  %p2642_p3 = pnand %p2641_p2, %p2635_p13 }
  0x22   : > { %2377 = vmatpush3.bf16.msra.mxu1 %v2344_v40  ;;  %2345 = vmatpush3.bf16.msra.mxu0 %v2344_v40 }
  0x23   : > { %2379 = vmatprep.subr.bf16.mxu1 %v2346_v41  ;;  %2347 = vmatprep.subr.bf16.mxu0 %v2346_v41  ;;  %v888_v41 = vld [vmem:[%s3661_s2 + $0x30] sm:$0xff] }
  0x24   : > { %v2394_v43 = vpack.c.bf16 %v889_v42, %v888_v41 }
  0x25   : > { %619 = vperm.xlu1 %2500, %v2885_v38   ;;  %616 = vperm.xlu0 %2499, %v259_v39  }
  0x26   : > { %2381 = vmatpush3.bf16.msra.mxu1 %v2348_v48  ;;  %2349 = vmatpush3.bf16.msra.mxu0 %v2348_v48  ;;  %v1319_v48 = vld [vmem:[%s3663_s4 + $0x18] sm:$0xff] }
  0x27   : > { %2383 = vmatprep.subr.bf16.mxu1 %v2350_v49  ;;  %2351 = vmatprep.subr.bf16.mxu0 %v2350_v49  ;;  %v1316_v49 = vld [vmem:[%s3663_s4] sm:$0xff] }
  0x29   : > { %625 = vperm.xlu1 %2500, %v262_v46   ;;  %622 = vperm.xlu0 %2499, %v261_v47  }
  0x2a   : > { %2385 = vmatpush3.bf16.msra.mxu1 %v2352_v56  ;;  %2353 = vmatpush3.bf16.msra.mxu0 %v2352_v56  ;;  %v1320_v56 = vld [vmem:[%s3663_s4 + $0x20] sm:$0xff] }
  0x2b   : > { %2387 = vmatprep.subr.bf16.mxu1 %v2354_v57  ;;  %2355 = vmatprep.subr.bf16.mxu0 %v2354_v57  ;;  %v1322_v57 = vld [vmem:[%s3663_s4 + $0x30] sm:$0xff] }
  0x2d   : > { %631 = vperm.xlu1 %2500, %v264_v54   ;;  %628 = vperm.xlu0 %2499, %v263_v55  }
  0x2e   : > { %2389 = vmatpush3.bf16.msra.mxu1 %v2356_v62  ;;  %2357 = vmatpush3.bf16.msra.mxu0 %v2356_v62  ;;  %v1324_v62 = vld [vmem:[%s3663_s4 + $0x40] sm:$0xff] }
  0x2f   : > { %2391 = vmatprep.subr.bf16.mxu0 %v2390_v5 }
  0x31   : > { %637 = vperm.xlu1 %2500, %v266_v60   ;;  %634 = vperm.xlu0 %2499, %v265_v61  }
  0x35   : > { %2501 = vset.pattern.permute.xlu1 %v2697_v0  ;;  %640 = vperm.xlu0 %2499, %v267_v63  }
  0x36   : > { %273 = vperm.xlu1 %2501, %v2837_v20  }
  0x39   : > { %643 = vperm.xlu0 %2499, %v268_v1  }
  0x3a   : > { %276 = vperm.xlu1 %2501, %v2848_v23  }
  0x3d   : > { %2502 = vset.pattern.permute.xlu0 %v2697_v0  ;;  %v1329_v0 = vld [vmem:[%s3663_s4 + $0x68] sm:$0xff] }
  0x3e   : > { %282 = vperm.xlu1 %2501, %v2845_v22   ;;  %279 = vperm.xlu0 %2502, %v2834_v19  }
  0x42   : > { %285 = vperm.xlu1 %2501, %v2868_v31   ;;  %288 = vperm.xlu0 %2502, %v2865_v30  }
  0x46   : > { %291 = vperm.xlu1 %2501, %v259_v39   ;;  %294 = vperm.xlu0 %2502, %v2885_v38  }
  0x4a   : > { %297 = vperm.xlu1 %2501, %v261_v47   ;;  %300 = vperm.xlu0 %2502, %v262_v46   ;;  %v3099_v46 = vpack.c.bf16 %v594_v45, %v593_v44  ;;  %v1317_v47 = vld [vmem:[%s3663_s4 + $0x8] sm:$0xff] }
  0x4b   : > { %v2406_v50 = vpack.c.bf16 %v1319_v48, %v1317_v47 }
  0x4d   : > { %2407 = vmatprep.subr.bf16.mxu1 %v2406_v50 }
  0x4e   : > { %303 = vperm.xlu1 %2501, %v263_v55   ;;  %306 = vperm.xlu0 %2502, %v264_v54   ;;  %v2408_v54 = vpack.c.bf16 %v1318_v51, %v1316_v49  ;;  %v2410_v55 = vpack.c.bf16 %v1323_v53, %v1321_v52 }
  0x52   : > { %309 = vperm.xlu1 %2501, %v265_v61   ;;  %312 = vperm.xlu0 %2502, %v266_v60   ;;  %v2412_v60 = vpack.c.bf16 %v1322_v57, %v1320_v56  ;;  %v2414_v61 = vpack.c.bf16 %v1327_v59, %v1325_v58 }
  0x56   : > { %315 = vperm.xlu1 %2501, %v267_v63   ;;  %318 = vperm.xlu0 %2502, %v268_v1   ;;  %v1326_v63 = vld [vmem:[%s3663_s4 + $0x50] sm:$0xff]  ;;  %v1331_v1 = vld [vmem:[%s3663_s4 + $0x78] sm:$0xff] }
  0x57   : > { %v2416_v2 = vpack.c.bf16 %v1326_v63, %v1324_v62  ;;  %v2418_v4 = vpack.c.bf16 %v1331_v1, %v1329_v0 }
  0x5a   : > { %2503 = vset.pattern.permute.xlu0 %v2696_v3  ;;  %v2698_v3 = vmov 1.0  }
  0x98   : > { %v605_v9 = vpop.permute.xlu1 %604  ;;  %v599_v10 = vpop.permute.xlu0 %598 }
  0x99   : > { %vm645_vm0 = vcmp.eq.s32.totalorder %v2942_v7, %v599_v10  ;;  %vm646_vm1 = vcmp.eq.s32.totalorder %v2945_v8, %v599_v10  ;;  %vm650_vm2 = vcmp.eq.s32.totalorder %v2945_v8, %v605_v9  ;;  %vm649_vm5 = vcmp.eq.s32.totalorder %v2942_v7, %v605_v9  ;;  %v1335_v9 = vld [vmem:[%s3663_s4 + $0x98] sm:$0xff] }
  0x9a   : > { %1989 = vmatprep.mubr.msk.f32.mxu1 %vm646_vm1, %v2698_v3 }
  0x9b   : > { %1990 = vmatmul.mubr.msk.f32.vlgmr.msra.gmra.mrb[0].mxu1 %vm645_vm0, %v2698_v3 }
  0x9c   : > { %v608_v11 = vpop.permute.xlu1 %607  ;;  %v602_v12 = vpop.permute.xlu0 %601  ;;  %2409 = vmatpush1.bf16.msra.mxu1 %v2408_v54 }
  0x9d   : > { %vm647_vm3 = vcmp.eq.s32.totalorder %v2942_v7, %v602_v12  ;;  %vm648_vm4 = vcmp.eq.s32.totalorder %v2945_v8, %v602_v12  ;;  %vm652_vm6 = vcmp.eq.s32.totalorder %v2945_v8, %v608_v11  ;;  %vm651_vm7 = vcmp.eq.s32.totalorder %v2942_v7, %v608_v11  ;;  %2411 = vmatprep.subr.bf16.mxu1 %v2410_v55  ;;  %v1332_v11 = vld [vmem:[%s3663_s4 + $0x80] sm:$0xff]  ;;  %v1334_v12 = vld [vmem:[%s3663_s4 + $0x90] sm:$0xff] }
  0x9e   : > { %1991 = vmatprep.mubr.msk.f32.mxu1 %vm648_vm4, %v2698_v3 }
  0x9f   : > { %1992 = vmatmul.mubr.msk.f32.gmra.mrb[2].mxu1 %vm647_vm3, %v2698_v3 }
  0xa0   : > { %v614_v13 = vpop.permute.xlu1 %613  ;;  %v611_v14 = vpop.permute.xlu0 %610  ;;  %1993 = vmatprep.mubr.msk.f32.mxu1 %vm650_vm2, %v2698_v3  ;;  %2413 = vmatpush1.bf16.msra.mxu1 %v2412_v60 }
  0xa1   : > { %vm654_vm8 = vcmp.eq.s32.totalorder %v2945_v8, %v611_v14  ;;  %vm653_vm9 = vcmp.eq.s32.totalorder %v2942_v7, %v611_v14  ;;  %vm656_vm10 = vcmp.eq.s32.totalorder %v2945_v8, %v614_v13  ;;  %vm655_vm11 = vcmp.eq.s32.totalorder %v2942_v7, %v614_v13  ;;  %2415 = vmatprep.subr.bf16.mxu1 %v2414_v61  ;;  %v1337_v13 = vld [vmem:[%s3663_s4 + $0xa8] sm:$0xff]  ;;  %v1339_v14 = vld [vmem:[%s3663_s4 + $0xb8] sm:$0xff] }
  0xa3   : > { %1994 = vmatmul.mubr.msk.f32.gmra.mrb[4].mxu1 %vm649_vm5, %v2698_v3 }
  0xa4   : > { %v620_v15 = vpop.permute.xlu1 %619  ;;  %1995 = vmatprep.mubr.msk.f32.mxu1 %vm652_vm6, %v2698_v3  ;;  %v617_v16 = vpop.permute.xlu0 %616  ;;  %2417 = vmatpush1.bf16.msra.mxu1 %v2416_v2 }
  0xa5   : > { %vm658_vm12 = vcmp.eq.s32.totalorder %v2945_v8, %v617_v16  ;;  %vm657_vm13 = vcmp.eq.s32.totalorder %v2942_v7, %v617_v16  ;;  %vm660_vm14 = vcmp.eq.s32.totalorder %v2945_v8, %v620_v15  ;;  %vm659_vm15 = vcmp.eq.s32.totalorder %v2942_v7, %v620_v15  ;;  %2419 = vmatprep.subr.bf16.mxu1 %v2418_v4 }
  0xa6   : > { %v2424_v15 = vpack.c.bf16 %v1334_v12, %v1332_v11  ;;  %v2426_v16 = vpack.c.bf16 %v1339_v14, %v1337_v13 }
  0xa7   : > { %1996 = vmatmul.mubr.msk.f32.gmra.mrb[6].mxu1 %vm651_vm7, %v2698_v3 }
  0xa8   : > { %v626_v17 = vpop.permute.xlu1 %625  ;;  %1997 = vmatprep.mubr.msk.f32.mxu1 %vm654_vm8, %v2698_v3  ;;  %v623_v18 = vpop.permute.xlu0 %622 }
  0xa9   : > { %vm662_vm2 = vcmp.eq.s32.totalorder %v2945_v8, %v623_v18  ;;  %vm661_vm3 = vcmp.eq.s32.totalorder %v2942_v7, %v623_v18  ;;  %vm664_vm6 = vcmp.eq.s32.totalorder %v2945_v8, %v626_v17  ;;  %vm663_vm7 = vcmp.eq.s32.totalorder %v2942_v7, %v626_v17  ;;  %v1336_v17 = vld [vmem:[%s3663_s4 + $0xa0] sm:$0xff]  ;;  %v1338_v18 = vld [vmem:[%s3663_s4 + $0xb0] sm:$0xff] }
  0xab   : > { %1998 = vmatmul.mubr.msk.f32.gmra.mrb[8].mxu1 %vm653_vm9, %v2698_v3 }
  0xac   : > { %v632_v19 = vpop.permute.xlu1 %631  ;;  %1999 = vmatprep.mubr.msk.f32.mxu1 %vm656_vm10, %v2698_v3  ;;  %v629_v20 = vpop.permute.xlu0 %628 }
  0xaf   : > { %2000 = vmatmul.mubr.msk.f32.gmra.mrb[10].mxu1 %vm655_vm11, %v2698_v3  ;;  %vm666_vm11 = vcmp.eq.s32.totalorder %v2945_v8, %v629_v20 }
  0xb0   : > { %v2972_v21 = vpop.permute.xlu1 %637  ;;  %2001 = vmatprep.mubr.msk.f32.mxu1 %vm658_vm12, %v2698_v3  ;;  %v635_v22 = vpop.permute.xlu0 %634 }
  0xb3   : > { %2002 = vmatmul.mubr.msk.f32.gmra.mrb[12].mxu1 %vm657_vm13, %v2698_v3  ;;  %vm665_vm13 = vcmp.eq.s32.totalorder %v2942_v7, %v629_v20  ;;  %v1343_v20 = vld [vmem:[%s3663_s4 + $0xd8] sm:$0xff] }
  0xb4   : > { %2003 = vmatprep.mubr.msk.f32.mxu1 %vm660_vm14, %v2698_v3  ;;  %v2979_v23 = vpop.permute.xlu0 %640 }
  0xb5   : > { %v274_v24 = vpop.permute.xlu1 %273 }
  0xb6   : > { %vm320_vm0 = vcmp.eq.s32.totalorder %v2942_v7, %v274_v24  ;;  %vm321_vm1 = vcmp.eq.s32.totalorder %v2945_v8, %v274_v24  ;;  %v1342_v24 = vld [vmem:[%s3663_s4 + $0xd0] sm:$0xff] }
  0xb7   : > { %1925 = vmatprep.mubr.msk.f32.mxu0 %vm321_vm1, %v2698_v3  ;;  %2004 = vmatmul.mubr.msk.f32.gmra.mrb[14].mxu1 %vm659_vm15, %v2698_v3  ;;  %vm668_vm15 = vcmp.eq.s32.totalorder %v2945_v8, %v632_v19  ;;  %vm667_vm1 = vcmp.eq.s32.totalorder %v2942_v7, %v632_v19  ;;  %v1341_v19 = vld [vmem:[%s3663_s4 + $0xc8] sm:$0xff] }
  0xb8   : > { %1926 = vmatmul.mubr.msk.f32.vlgmr.msra.gmra.mrb[0].mxu0 %vm320_vm0, %v2698_v3  ;;  %2005 = vmatprep.mubr.msk.f32.mxu1 %vm662_vm2, %v2698_v3  ;;  %v2989_v25 = vpop.permute.xlu0 %643 }
  0xb9   : > { %v277_v26 = vpop.permute.xlu1 %276  ;;  %2393 = vmatpush3.bf16.msra.mxu0 %v2390_v5  ;;  %v1328_v5 = vld [vmem:[%s3663_s4 + $0x60] sm:$0xff] }
  0xba   : > { %vm322_vm4 = vcmp.eq.s32.totalorder %v2942_v7, %v277_v26  ;;  %vm323_vm5 = vcmp.eq.s32.totalorder %v2945_v8, %v277_v26  ;;  %2395 = vmatprep.subr.bf16.mxu0 %v2394_v43 }
  0xbb   : > { %1927 = vmatprep.mubr.msk.f32.mxu0 %vm323_vm5, %v2698_v3  ;;  %2006 = vmatmul.mubr.msk.f32.gmra.mrb[16].mxu1 %vm661_vm3, %v2698_v3  ;;  %vm670_vm3 = vcmp.eq.s32.totalorder %v2945_v8, %v635_v22  ;;  %vm669_vm5 = vcmp.eq.s32.totalorder %v2942_v7, %v635_v22  ;;  %v2430_v22 = vpack.c.bf16 %v1343_v20, %v1341_v19 }
  0xbc   : > { %1928 = vmatmul.mubr.msk.f32.gmra.mrb[2].mxu0 %vm322_vm4, %v2698_v3  ;;  %2007 = vmatprep.mubr.msk.f32.mxu1 %vm664_vm6, %v2698_v3 }
  0xbd   : > { %v283_v27 = vpop.permute.xlu1 %282  ;;  %v280_v28 = vpop.permute.xlu0 %279  ;;  %2397 = vmatpush3.bf16.msra.mxu0 %v2394_v43 }
  0xbe   : > { %vm327_vm8 = vcmp.eq.s32.totalorder %v2945_v8, %v283_v27  ;;  %vm324_vm9 = vcmp.eq.s32.totalorder %v2942_v7, %v280_v28  ;;  %vm325_vm10 = vcmp.eq.s32.totalorder %v2945_v8, %v280_v28  ;;  %vm326_vm12 = vcmp.eq.s32.totalorder %v2942_v7, %v283_v27  ;;  %2399 = vmatprep.subr.bf16.mxu0 %v3099_v46 }
  0xbf   : > { %1929 = vmatprep.mubr.msk.f32.mxu0 %vm325_vm10, %v2698_v3  ;;  %2008 = vmatmul.mubr.msk.f32.gmra.mrb[18].mxu1 %vm663_vm7, %v2698_v3  ;;  %vm672_vm7 = vcmp.eq.s32.totalorder %v2945_v8, %v2972_v21 }
  0xc0   : > { %1930 = vmatmul.mubr.msk.f32.gmra.mrb[4].mxu0 %vm324_vm9, %v2698_v3  ;;  %2009 = vmatprep.mubr.msk.f32.mxu1 %vm666_vm11, %v2698_v3  ;;  %vm671_vm9 = vcmp.eq.s32.totalorder %v2942_v7, %v2972_v21  ;;  %vm674_vm11 = vcmp.eq.s32.totalorder %v2945_v8, %v2979_v23  ;;  %v2428_v21 = vpack.c.bf16 %v1338_v18, %v1336_v17 }
  0xc1   : > { %v286_v29 = vpop.permute.xlu1 %285  ;;  %1931 = vmatprep.mubr.msk.f32.mxu0 %vm327_vm8, %v2698_v3  ;;  %v289_v30 = vpop.permute.xlu0 %288 }
  0xc2   : > { %vm329_vm14 = vcmp.eq.s32.totalorder %v2945_v8, %v286_v29  ;;  %vm328_vm0 = vcmp.eq.s32.totalorder %v2942_v7, %v286_v29  ;;  %vm331_vm2 = vcmp.eq.s32.totalorder %v2945_v8, %v289_v30  ;;  %vm330_vm4 = vcmp.eq.s32.totalorder %v2942_v7, %v289_v30  ;;  %v595_v29 = vld [vmem:[%s3661_s2 + $0x10] sm:$0xff]  ;;  %v596_v30 = vld [vmem:[%s3661_s2 + $0x18] sm:$0xff] }
  0xc3   : > { %2010 = vmatmul.mubr.msk.f32.gmra.mrb[20].mxu1 %vm665_vm13, %v2698_v3  ;;  %vm673_vm13 = vcmp.eq.s32.totalorder %v2942_v7, %v2979_v23  ;;  %v1340_v23 = vld [vmem:[%s3663_s4 + $0xc0] sm:$0xff] }
  0xc4   : > { %1932 = vmatmul.mubr.msk.f32.gmra.mrb[6].mxu0 %vm326_vm12, %v2698_v3  ;;  %2011 = vmatprep.mubr.msk.f32.mxu1 %vm668_vm15, %v2698_v3  ;;  %vm676_vm15 = vcmp.eq.s32.totalorder %v2945_v8, %v2989_v25 }
  0xc5   : > { %1933 = vmatprep.mubr.msk.f32.mxu0 %vm329_vm14, %v2698_v3  ;;  %v292_v31 = vpop.permute.xlu1 %291  ;;  %v295_v32 = vpop.permute.xlu0 %294 }
  0xc6   : > { %vm333_vm6 = vcmp.eq.s32.totalorder %v2945_v8, %v292_v31  ;;  %vm332_vm8 = vcmp.eq.s32.totalorder %v2942_v7, %v292_v31  ;;  %vm335_vm10 = vcmp.eq.s32.totalorder %v2945_v8, %v295_v32  ;;  %vm334_vm12 = vcmp.eq.s32.totalorder %v2942_v7, %v295_v32 }
  0xc7   : > { %2012 = vmatmul.mubr.msk.f32.gmra.mrb[22].mxu1 %vm667_vm1, %v2698_v3 }
  0xc8   : > { %1934 = vmatmul.mubr.msk.f32.gmra.mrb[8].mxu0 %vm328_vm0, %v2698_v3  ;;  %2013 = vmatprep.mubr.msk.f32.mxu1 %vm670_vm3, %v2698_v3  ;;  %vm675_vm0 = vcmp.eq.s32.totalorder %v2942_v7, %v2989_v25  ;;  %v2432_v25 = vpack.c.bf16 %v1342_v24, %v1340_v23 }
  0xc9   : > { %1935 = vmatprep.mubr.msk.f32.mxu0 %vm331_vm2, %v2698_v3  ;;  %v298_v33 = vpop.permute.xlu1 %297  ;;  %v301_v34 = vpop.permute.xlu0 %300 }
  0xca   : > { %vm337_vm14 = vcmp.eq.s32.totalorder %v2945_v8, %v298_v33  ;;  %vm339_vm1 = vcmp.eq.s32.totalorder %v2945_v8, %v301_v34  ;;  %vm336_vm2 = vcmp.eq.s32.totalorder %v2942_v7, %v298_v33  ;;  %vm338_vm3 = vcmp.eq.s32.totalorder %v2942_v7, %v301_v34 }
  0xcb   : > { %2014 = vmatmul.mubr.msk.f32.gmra.mrb[24].mxu1 %vm669_vm5, %v2698_v3  ;;  %v2402_v34 = vpack.c.bf16 %v596_v30, %v595_v29 }
  0xcc   : > { %1936 = vmatmul.mubr.msk.f32.gmra.mrb[10].mxu0 %vm330_vm4, %v2698_v3  ;;  %2015 = vmatprep.mubr.msk.f32.mxu1 %vm672_vm7, %v2698_v3 }
  0xcd   : > { %1937 = vmatprep.mubr.msk.f32.mxu0 %vm333_vm6, %v2698_v3  ;;  %v304_v35 = vpop.permute.xlu1 %303  ;;  %v307_v36 = vpop.permute.xlu0 %306 }
  0xce   : > { %vm341_vm4 = vcmp.eq.s32.totalorder %v2945_v8, %v304_v35  ;;  %vm340_vm5 = vcmp.eq.s32.totalorder %v2942_v7, %v304_v35  ;;  %vm343_vm6 = vcmp.eq.s32.totalorder %v2945_v8, %v307_v36  ;;  %vm342_vm7 = vcmp.eq.s32.totalorder %v2942_v7, %v307_v36 }
  0xcf   : > { %2016 = vmatmul.mubr.msk.f32.gmra.mrb[26].mxu1 %vm671_vm9, %v2698_v3 }
  0xd0   : > { %1938 = vmatmul.mubr.msk.f32.gmra.mrb[12].mxu0 %vm332_vm8, %v2698_v3  ;;  %2017 = vmatprep.mubr.msk.f32.mxu1 %vm674_vm11, %v2698_v3 }
  0xd1   : > { %1939 = vmatprep.mubr.msk.f32.mxu0 %vm335_vm10, %v2698_v3  ;;  %v310_v37 = vpop.permute.xlu1 %309  ;;  %v313_v38 = vpop.permute.xlu0 %312 }
  0xd2   : > { %vm345_vm8 = vcmp.eq.s32.totalorder %v2945_v8, %v310_v37  ;;  %vm344_vm9 = vcmp.eq.s32.totalorder %v2942_v7, %v310_v37  ;;  %vm347_vm10 = vcmp.eq.s32.totalorder %v2945_v8, %v313_v38  ;;  %vm346_vm11 = vcmp.eq.s32.totalorder %v2942_v7, %v313_v38 }
  0xd3   : > { %2018 = vmatmul.mubr.msk.f32.gmra.mrb[28].mxu1 %vm673_vm13, %v2698_v3 }
  0xd4   : > { %1940 = vmatmul.mubr.msk.f32.gmra.mrb[14].mxu0 %vm334_vm12, %v2698_v3  ;;  %2019 = vmatprep.mubr.msk.f32.mxu1 %vm676_vm15, %v2698_v3 }
  0xd5   : > { %1941 = vmatprep.mubr.msk.f32.mxu0 %vm337_vm14, %v2698_v3  ;;  %v316_v39 = vpop.permute.xlu1 %315  ;;  %v319_v40 = vpop.permute.xlu0 %318 }
  0xd6   : > { %vm349_vm12 = vcmp.eq.s32.totalorder %v2945_v8, %v316_v39  ;;  %vm348_vm13 = vcmp.eq.s32.totalorder %v2942_v7, %v316_v39  ;;  %vm351_vm14 = vcmp.eq.s32.totalorder %v2945_v8, %v319_v40  ;;  %vm350_vm15 = vcmp.eq.s32.totalorder %v2942_v7, %v319_v40  ;;  %v1330_v7 = vld [vmem:[%s3663_s4 + $0x70] sm:$0xff]  ;;  %v1333_v8 = vld [vmem:[%s3663_s4 + $0x88] sm:$0xff] }
  0xd7   : > { %2020 = vmatmul.mubr.msk.f32.gmra.mrb[30].mxu1 %vm675_vm0, %v2698_v3  ;;  %v2420_v10 = vpack.c.bf16 %v1330_v7, %v1328_v5  ;;  %vm890_vm0 = vcmask 261120  }
  0xd8   : > { %1942 = vmatmul.mubr.msk.f32.gmra.mrb[16].mxu0 %vm336_vm2, %v2698_v3 }
  0xd9   : > { %1943 = vmatprep.mubr.msk.f32.mxu0 %vm339_vm1, %v2698_v3  ;;  %2421 = vmatpush1.bf16.msra.mxu1 %v2420_v10 }
  0xdc   : > { %1944 = vmatmul.mubr.msk.f32.gmra.mrb[18].mxu0 %vm338_vm3, %v2698_v3 }
  0xdd   : > { %1945 = vmatprep.mubr.msk.f32.mxu0 %vm341_vm4, %v2698_v3 }
  0xe0   : > { %1946 = vmatmul.mubr.msk.f32.gmra.mrb[20].mxu0 %vm340_vm5, %v2698_v3 }
  0xe1   : > { %1947 = vmatprep.mubr.msk.f32.mxu0 %vm343_vm6, %v2698_v3 }
  0xe4   : > { %1948 = vmatmul.mubr.msk.f32.gmra.mrb[22].mxu0 %vm342_vm7, %v2698_v3 }
  0xe5   : > { %1949 = vmatprep.mubr.msk.f32.mxu0 %vm345_vm8, %v2698_v3 }
  0xe8   : > { %1950 = vmatmul.mubr.msk.f32.gmra.mrb[24].mxu0 %vm344_vm9, %v2698_v3 }
  0xe9   : > { %1951 = vmatprep.mubr.msk.f32.mxu0 %vm347_vm10, %v2698_v3 }
  0xec   : > { %1952 = vmatmul.mubr.msk.f32.gmra.mrb[26].mxu0 %vm346_vm11, %v2698_v3 }
  0xed   : > { %1953 = vmatprep.mubr.msk.f32.mxu0 %vm349_vm12, %v2698_v3 }
  0xf0   : > { %1954 = vmatmul.mubr.msk.f32.gmra.mrb[28].mxu0 %vm348_vm13, %v2698_v3 }
  0xf1   : > { %1955 = vmatprep.mubr.msk.f32.mxu0 %vm351_vm14, %v2698_v3 }
  0xf4   : > { %1956 = vmatmul.mubr.msk.f32.gmra.mrb[30].mxu0 %vm350_vm15, %v2698_v3  ;;  %v2422_v3 = vpack.c.bf16 %v1335_v9, %v1333_v8 }
  0xf6   : > { %2423 = vmatprep.subr.bf16.mxu1 %v2422_v3 }
  0xf7   : > { %2425 = vmatpush1.bf16.msra.mxu1 %v2424_v15 }
  0xf8   : > { %2427 = vmatprep.subr.bf16.mxu1 %v2426_v16 }
  0xfb   : > { %2429 = vmatpush1.bf16.msra.mxu1 %v2428_v21 }
  0xfc   : > { %2431 = vmatprep.subr.bf16.mxu1 %v2430_v22 }
  0xff   : > { %2433 = vmatpush1.bf16.msra.mxu1 %v2432_v25 }
 0x16e   : > { %v2174_v26 = vpop.f32.mrb[0].mxu1 }
 0x16f   : > { %v2175_v27 = vpop.f32.mrb[1].mxu1 }
 0x170   : > { %v2176_v28 = vadd.f32 %v2175_v27, %v2174_v26 }
 0x172   : > { %v2177_v31 = vpop.f32.mrb[2].mxu1  ;;  %2270 = vmatprep.mubr.msk.f32.mxu0 %vm890_vm0, %v2176_v28 }
 0x173   : > { %v2178_v32 = vpop.f32.mrb[3].mxu1 }
 0x174   : > { %v2179_v33 = vadd.f32 %v2178_v32, %v2177_v31 }
 0x176   : > { %v2180_v35 = vpop.f32.mrb[4].mxu1  ;;  %2271 = vmatmul.mubr.msk.f32.vlgmr.msra.gmra.mrb[32].mxu0 %vm890_vm0, %v2179_v33 }
 0x177   : > { %v2181_v36 = vpop.f32.mrb[5].mxu1  ;;  %2401 = vmatpush3.bf16.msra.mxu0 %v3099_v46 }
 0x178   : > { %v2182_v37 = vadd.f32 %v2181_v36, %v2180_v35  ;;  %2403 = vmatprep.subr.bf16.mxu0 %v2402_v34 }
 0x17a   : > { %v2183_v38 = vpop.f32.mrb[6].mxu1  ;;  %2273 = vmatprep.mubr.msk.f32.mxu0 %vm890_vm0, %v2182_v37 }
 0x17b   : > { %v2184_v39 = vpop.f32.mrb[7].mxu1  ;;  %2405 = vmatpush3.bf16.msra.mxu0 %v2402_v34 }
 0x17c   : > { %v2185_v40 = vadd.f32 %v2184_v39, %v2183_v38 }
 0x17e   : > { %v2186_v41 = vpop.f32.mrb[8].mxu1  ;;  %2274 = vmatmul.mubr.msk.f32.gmra.mrb[34].mxu0 %vm890_vm0, %v2185_v40 }
 0x17f   : > { %v2187_v42 = vpop.f32.mrb[9].mxu1 }
 0x180   : > { %v2188_v43 = vadd.f32 %v2187_v42, %v2186_v41 }
 0x182   : > { %v2189_v44 = vpop.f32.mrb[10].mxu1  ;;  %2276 = vmatprep.mubr.msk.f32.mxu0 %vm890_vm0, %v2188_v43 }
 0x183   : > { %v2190_v45 = vpop.f32.mrb[11].mxu1 }
 0x184   : > { %v2191_v47 = vadd.f32 %v2190_v45, %v2189_v44 }
 0x186   : > { %v2192_v48 = vpop.f32.mrb[12].mxu1  ;;  %2277 = vmatmul.mubr.msk.f32.gmra.mrb[36].mxu0 %vm890_vm0, %v2191_v47 }
 0x187   : > { %v2193_v46 = vpop.f32.mrb[13].mxu1 }
 0x188   : > { %v2194_v49 = vadd.f32 %v2193_v46, %v2192_v48 }
 0x18a   : > { %v2195_v50 = vpop.f32.mrb[14].mxu1  ;;  %2279 = vmatprep.mubr.msk.f32.mxu0 %vm890_vm0, %v2194_v49 }
 0x18b   : > { %v2196_v51 = vpop.f32.mrb[15].mxu1  ;;  %v2094_v52 = vpop.f32.mrb[0].mxu0 }
 0x18c   : > { %v2197_v53 = vadd.f32 %v2196_v51, %v2195_v50  ;;  %v2095_v54 = vpop.f32.mrb[1].mxu0 }
 0x18d   : > { %v2096_v55 = vadd.f32 %v2095_v54, %v2094_v52 }
 0x18e   : > { %v2198_v56 = vpop.f32.mrb[16].mxu1  ;;  %2280 = vmatmul.mubr.msk.f32.gmra.mrb[38].mxu0 %vm890_vm0, %v2197_v53 }
 0x18f   : > { %v2199_v57 = vpop.f32.mrb[17].mxu1  ;;  %v2097_v58 = vpop.f32.mrb[2].mxu0 }
 0x190   : > { %v2200_v59 = vadd.f32 %v2199_v57, %v2198_v56  ;;  %v2098_v60 = vpop.f32.mrb[3].mxu0 }
 0x191   : > { %v2099_v61 = vadd.f32 %v2098_v60, %v2097_v58 }
 0x192   : > { %v2201_v62 = vpop.f32.mrb[18].mxu1  ;;  %2282 = vmatprep.mubr.msk.f32.mxu0 %vm890_vm0, %v2200_v59 }
 0x193   : > { %v2202_v63 = vpop.f32.mrb[19].mxu1  ;;  %v2100_v0 = vpop.f32.mrb[4].mxu0 }
 0x194   : > { %v2203_v1 = vadd.f32 %v2202_v63, %v2201_v62  ;;  %v2101_v2 = vpop.f32.mrb[5].mxu0  ;;  %v1345_v62 = vld [vmem:[%s3663_s4 + $0xe8] sm:$0xff]  ;;  %v1347_v63 = vld [vmem:[%s3663_s4 + $0xf8] sm:$0xff] }
 0x195   : > { %v2102_v4 = vadd.f32 %v2101_v2, %v2100_v0  ;;  %v1344_v0 = vld [vmem:[%s3663_s4 + $0xe0] sm:$0xff]  ;;  %v1346_v2 = vld [vmem:[%s3663_s4 + $0xf0] sm:$0xff] }
 0x196   : > { %v2204_v5 = vpop.f32.mrb[20].mxu1  ;;  %2283 = vmatmul.mubr.msk.f32.gmra.mrb[40].mxu0 %vm890_vm0, %v2203_v1  ;;  %v2434_v1 = vpack.c.bf16 %v1347_v63, %v1345_v62 }
 0x197   : > { %v2205_v7 = vpop.f32.mrb[21].mxu1  ;;  %v2103_v8 = vpop.f32.mrb[6].mxu0 }
 0x198   : > { %v2206_v9 = vadd.f32 %v2205_v7, %v2204_v5  ;;  %v2104_v10 = vpop.f32.mrb[7].mxu0  ;;  %2435 = vmatprep.subr.bf16.mxu1 %v2434_v1  ;;  %v2699_v5 = vmov 0.0   ;;  %v3241_v7 = vld [vmem:[%s3662_s3] ss:$0 sm:$0xff] }
 0x199   : > { %v2105_v3 = vadd.f32 %v2104_v10, %v2103_v8  ;;  %1424 = vmatprep.mubr.f32.mxu1 %v2699_v5 }
 0x19a   : > { %v2207_v11 = vpop.f32.mrb[22].mxu1  ;;  %2285 = vmatprep.mubr.msk.f32.mxu0 %vm890_vm0, %v2206_v9 }
 0x19b   : > { %v2208_v12 = vpop.f32.mrb[23].mxu1  ;;  %v2106_v13 = vpop.f32.mrb[8].mxu0 }
 0x19c   : > { %v2209_v14 = vadd.f32 %v2208_v12, %v2207_v11  ;;  %v2107_v15 = vpop.f32.mrb[9].mxu0 }
 0x19d   : > { %v2108_v16 = vadd.f32 %v2107_v15, %v2106_v13 }
 0x19e   : > { %v2210_v17 = vpop.f32.mrb[24].mxu1  ;;  %2286 = vmatmul.mubr.msk.f32.gmra.mrb[42].mxu0 %vm890_vm0, %v2209_v14 }
 0x19f   : > { %v2211_v18 = vpop.f32.mrb[25].mxu1  ;;  %v2109_v19 = vpop.f32.mrb[10].mxu0 }
 0x1a0   : > { %v2212_v20 = vadd.f32 %v2211_v18, %v2210_v17  ;;  %v2110_v21 = vpop.f32.mrb[11].mxu0 }
 0x1a1   : > { %v2111_v22 = vadd.f32 %v2110_v21, %v2109_v19 }
 0x1a2   : > { %v2213_v23 = vpop.f32.mrb[26].mxu1  ;;  %2288 = vmatprep.mubr.msk.f32.mxu0 %vm890_vm0, %v2212_v20 }
 0x1a3   : > { %v2214_v24 = vpop.f32.mrb[27].mxu1  ;;  %v2112_v25 = vpop.f32.mrb[12].mxu0 }
 0x1a4   : > { %v2215_v26 = vadd.f32 %v2214_v24, %v2213_v23  ;;  %v2113_v27 = vpop.f32.mrb[13].mxu0 }
 0x1a5   : > { %v2114_v28 = vadd.f32 %v2113_v27, %v2112_v25 }
 0x1a6   : > { %v2216_v29 = vpop.f32.mrb[28].mxu1  ;;  %2289 = vmatmul.mubr.msk.f32.gmra.mrb[44].mxu0 %vm890_vm0, %v2215_v26 }
 0x1a7   : > { %v2217_v30 = vpop.f32.mrb[29].mxu1  ;;  %v2115_v31 = vpop.f32.mrb[14].mxu0 }
 0x1a8   : > { %v2218_v32 = vadd.f32 %v2217_v30, %v2216_v29  ;;  %v2116_v33 = vpop.f32.mrb[15].mxu0 }
 0x1a9   : > { %v2117_v34 = vadd.f32 %v2116_v33, %v2115_v31 }
 0x1aa   : > { %v2219_v35 = vpop.f32.mrb[30].mxu1  ;;  %2291 = vmatprep.mubr.msk.f32.mxu0 %vm890_vm0, %v2218_v32 }
 0x1ab   : > { %v2118_v36 = vpop.f32.mrb[16].mxu0  ;;  %v2220_v37 = vpop.f32.mrb[31].mxu1 }
 0x1ac   : > { %v2221_v38 = vadd.f32 %v2220_v37, %v2219_v35  ;;  %v2119_v39 = vpop.f32.mrb[17].mxu0 }
 0x1ad   : > { %v2120_v40 = vadd.f32 %v2119_v39, %v2118_v36 }
 0x1ae   : > { %2292 = vmatmul.mubr.msk.f32.gmra.mrb[46].mxu0 %vm890_vm0, %v2221_v38 }
 0x1af   : > { %2302 = vmatprep.mubr.msk.f32.mxu0 %vm890_vm0, %v2096_v55  ;;  %v2121_v41 = vpop.f32.mrb[18].mxu0 }
 0x1b0   : > { %v2122_v42 = vpop.f32.mrb[19].mxu0 }
 0x1b1   : > { %v2123_v43 = vadd.f32 %v2122_v42, %v2121_v41 }
 0x1b2   : > { %2303 = vmatmul.mubr.msk.f32.vlgmr.msra.gmra.mrb[32].mxu0 %vm890_vm0, %v2099_v61 }
 0x1b3   : > { %v2124_v44 = vpop.f32.mrb[20].mxu0  ;;  %2305 = vmatprep.mubr.msk.f32.mxu0 %vm890_vm0, %v2102_v4  ;;  %v2436_v4 = vpack.c.bf16 %v1346_v2, %v1344_v0 }
 0x1b4   : > { %v2125_v45 = vpop.f32.mrb[21].mxu0 }
 0x1b5   : > { %v2126_v47 = vadd.f32 %v2125_v45, %v2124_v44  ;;  %2437 = vmatpush1.bf16.msra.mxu1 %v2436_v4 }
 0x1b6   : > { %2306 = vmatmul.mubr.msk.f32.gmra.mrb[34].mxu0 %vm890_vm0, %v2105_v3 }
 0x1b7   : > { %v2127_v48 = vpop.f32.mrb[22].mxu0  ;;  %2308 = vmatprep.mubr.msk.f32.mxu0 %vm890_vm0, %v2108_v16 }
 0x1b8   : > { %v2128_v46 = vpop.f32.mrb[23].mxu0 }
 0x1b9   : > { %v2129_v49 = vadd.f32 %v2128_v46, %v2127_v48 }
 0x1ba   : > { %2309 = vmatmul.mubr.msk.f32.gmra.mrb[36].mxu0 %vm890_vm0, %v2111_v22 }
 0x1bb   : > { %v2130_v50 = vpop.f32.mrb[24].mxu0  ;;  %2311 = vmatprep.mubr.msk.f32.mxu0 %vm890_vm0, %v2114_v28 }
 0x1bc   : > { %v2131_v51 = vpop.f32.mrb[25].mxu0 }
 0x1bd   : > { %v2132_v52 = vadd.f32 %v2131_v51, %v2130_v50 }
 0x1be   : > { %2312 = vmatmul.mubr.msk.f32.gmra.mrb[38].mxu0 %vm890_vm0, %v2117_v34 }
 0x1bf   : > { %v2133_v53 = vpop.f32.mrb[26].mxu0  ;;  %2314 = vmatprep.mubr.msk.f32.mxu0 %vm890_vm0, %v2120_v40 }
 0x1c0   : > { %v2134_v54 = vpop.f32.mrb[27].mxu0 }
 0x1c1   : > { %v2135_v55 = vadd.f32 %v2134_v54, %v2133_v53 }
 0x1c2   : > { %2315 = vmatmul.mubr.msk.f32.gmra.mrb[40].mxu0 %vm890_vm0, %v2123_v43 }
 0x1c3   : > { %v2136_v56 = vpop.f32.mrb[28].mxu0  ;;  %2317 = vmatprep.mubr.msk.f32.mxu0 %vm890_vm0, %v2126_v47 }
 0x1c4   : > { %v2137_v57 = vpop.f32.mrb[29].mxu0 }
 0x1c5   : > { %v2138_v58 = vadd.f32 %v2137_v57, %v2136_v56  ;;  %v1348_v57 = vld [vmem:[%s3664_s5] sm:$0x3] }
 0x1c6   : > { %2318 = vmatmul.mubr.msk.f32.gmra.mrb[42].mxu0 %vm890_vm0, %v2129_v49 }
 0x1c7   : > { %v2139_v59 = vpop.f32.mrb[30].mxu0  ;;  %2320 = vmatprep.mubr.msk.f32.mxu0 %vm890_vm0, %v2132_v52 }
 0x1c8   : > { %v2140_v60 = vpop.f32.mrb[31].mxu0 }
 0x1c9   : > { %v2141_v61 = vadd.f32 %v2140_v60, %v2139_v59 }
 0x1ca   : > { %2321 = vmatmul.mubr.msk.f32.gmra.mrb[44].mxu0 %vm890_vm0, %v2135_v55  ;;  %v1351_v55 = vshrl.u32 %v269_v6, 7 }
 0x1cb   : > { %2323 = vmatprep.mubr.msk.f32.mxu0 %vm890_vm0, %v2138_v58 }
 0x1cc   : > { %v1352_v56 = vsub.s32 0, %v1351_v55  ;;  %v1356_v58 = vsub.s32 1, %v1351_v55 }
 0x1ce   : > { %2324 = vmatmul.mubr.msk.f32.gmra.mrb[46].mxu0 %vm890_vm0, %v2141_v61  ;;  %v3278_v59 = vrot.slane %v1348_v57, %v1352_v56  ;;  %v3280_v60 = vrot.slane %v1348_v57, %v1356_v58 }
 0x285   : > { %v2304_v8 = vpop.f32.mrb[32].mxu0 }
 0x286   : > { %v1198_v9 = vpop.f32.mrb[33].mxu0  ;;  %v1285_v3 = vadd.f32 %v2304_v8, %v3241_v7 }
 0x287   : > { %v1284_v10 = vadd.f32 %v3241_v7, %v1198_v9 }
 0x289   : > { %2504 = vtanh.f32 %v1284_v10  ;;  %v2307_v11 = vpop.f32.mrb[34].mxu0 }
 0x28a   : > { %v1208_v12 = vpop.f32.mrb[35].mxu0  ;;  %2506 = vtanh.f32 %v1285_v3  ;;  %v1287_v16 = vadd.f32 %v2307_v11, %v3241_v7 }
 0x28b   : > { %v1286_v13 = vadd.f32 %v3241_v7, %v1208_v12 }
 0x28d   : > { %v2310_v14 = vpop.f32.mrb[36].mxu0  ;;  %2508 = vtanh.f32 %v1286_v13 }
 0x28e   : > { %v1218_v15 = vpop.f32.mrb[37].mxu0  ;;  %2510 = vtanh.f32 %v1287_v16  ;;  %v1289_v24 = vadd.f32 %v2310_v14, %v3241_v7 }
 0x28f   : > { %v1288_v20 = vadd.f32 %v3241_v7, %v1218_v15 }
 0x291   : > { %v2313_v17 = vpop.f32.mrb[38].mxu0  ;;  %2512 = vtanh.f32 %v1288_v20 }
 0x292   : > { %v1228_v18 = vpop.f32.mrb[39].mxu0  ;;  %2514 = vtanh.f32 %v1289_v24  ;;  %v1291_v32 = vadd.f32 %v2313_v17, %v3241_v7 }
 0x293   : > { %v2505_v19 = vpop.eup %2504  ;;  %v1290_v28 = vadd.f32 %v3241_v7, %v1228_v18 }
 0x294   : > { %1425 = vmatmul.mubr.f32.vlgmr.msra.gmra.mrb[32].mxu1 %v2505_v19  ;;  %v2507_v23 = vpop.eup %2506 }
 0x295   : > { %v2316_v21 = vpop.f32.mrb[40].mxu0  ;;  %1430 = vmatprep.mubr.f32.mxu1 %v2699_v5  ;;  %2516 = vtanh.f32 %v1290_v28 }
 0x296   : > { %v1238_v22 = vpop.f32.mrb[41].mxu0  ;;  %2518 = vtanh.f32 %v1291_v32  ;;  %v1293_v38 = vadd.f32 %v2316_v21, %v3241_v7 }
 0x297   : > { %v2509_v27 = vpop.eup %2508  ;;  %v1292_v36 = vadd.f32 %v3241_v7, %v1238_v22 }
 0x298   : > { %1431 = vmatmul.mubr.f32.gmra.mrb[34].mxu1 %v2507_v23  ;;  %v2511_v31 = vpop.eup %2510 }
 0x299   : > { %v2319_v25 = vpop.f32.mrb[42].mxu0  ;;  %1436 = vmatprep.mubr.f32.mxu1 %v2699_v5  ;;  %2520 = vtanh.f32 %v1292_v36 }
 0x29a   : > { %v1248_v26 = vpop.f32.mrb[43].mxu0  ;;  %2522 = vtanh.f32 %v1293_v38  ;;  %v1295_v42 = vadd.f32 %v2319_v25, %v3241_v7 }
 0x29b   : > { %v2513_v35 = vpop.eup %2512  ;;  %v1294_v40 = vadd.f32 %v3241_v7, %v1248_v26 }
 0x29c   : > { %1437 = vmatmul.mubr.f32.gmra.mrb[36].mxu1 %v2509_v27  ;;  %v2515_v37 = vpop.eup %2514 }
 0x29d   : > { %v2322_v29 = vpop.f32.mrb[44].mxu0  ;;  %1442 = vmatprep.mubr.f32.mxu1 %v2699_v5  ;;  %2524 = vtanh.f32 %v1294_v40 }
 0x29e   : > { %v1258_v30 = vpop.f32.mrb[45].mxu0  ;;  %2526 = vtanh.f32 %v1295_v42  ;;  %v1297_v47 = vadd.f32 %v2322_v29, %v3241_v7 }
 0x29f   : > { %v2517_v39 = vpop.eup %2516  ;;  %v1296_v44 = vadd.f32 %v3241_v7, %v1258_v30 }
 0x2a0   : > { %1443 = vmatmul.mubr.f32.gmra.mrb[38].mxu1 %v2511_v31  ;;  %v2519_v41 = vpop.eup %2518 }
 0x2a1   : > { %v2325_v33 = vpop.f32.mrb[46].mxu0  ;;  %1448 = vmatprep.mubr.f32.mxu1 %v2699_v5  ;;  %2528 = vtanh.f32 %v1296_v44 }
 0x2a2   : > { %v1268_v34 = vpop.f32.mrb[47].mxu0  ;;  %2530 = vtanh.f32 %v1297_v47  ;;  %v1299_v50 = vadd.f32 %v2325_v33, %v3241_v7 }
 0x2a3   : > { %v2521_v43 = vpop.eup %2520  ;;  %v1298_v46 = vadd.f32 %v3241_v7, %v1268_v34 }
 0x2a4   : > { %1449 = vmatmul.mubr.f32.gmra.mrb[40].mxu1 %v2513_v35  ;;  %v2523_v45 = vpop.eup %2522 }
 0x2a5   : > { %1454 = vmatprep.mubr.f32.mxu1 %v2699_v5  ;;  %2532 = vtanh.f32 %v1298_v46 }
 0x2a6   : > { %2534 = vtanh.f32 %v1299_v50 }
 0x2a7   : > { %v2525_v48 = vpop.eup %2524 }
 0x2a8   : > { %1455 = vmatmul.mubr.f32.gmra.mrb[42].mxu1 %v2515_v37  ;;  %v2527_v49 = vpop.eup %2526 }
 0x2a9   : > { %1460 = vmatprep.mubr.f32.mxu1 %v2699_v5 }
 0x2ab   : > { %v2529_v51 = vpop.eup %2528 }
 0x2ac   : > { %1461 = vmatmul.mubr.f32.gmra.mrb[44].mxu1 %v2517_v39  ;;  %v2531_v52 = vpop.eup %2530 }
 0x2ad   : > { %1466 = vmatprep.mubr.f32.mxu1 %v2699_v5 }
 0x2af   : > { %v2533_v53 = vpop.eup %2532 }
 0x2b0   : > { %1467 = vmatmul.mubr.f32.gmra.mrb[46].mxu1 %v2519_v41  ;;  %v2535_v54 = vpop.eup %2534 }
 0x2b1   : > { %1472 = vmatprep.mubr.f32.mxu1 %v2699_v5 }
 0x2b4   : > { %1473 = vmatmul.mubr.f32.gmra.mrb[48].mxu1 %v2521_v43 }
 0x2b5   : > { %1478 = vmatprep.mubr.f32.mxu1 %v2699_v5 }
 0x2b8   : > { %1479 = vmatmul.mubr.f32.gmra.mrb[50].mxu1 %v2523_v45 }
 0x2b9   : > { %1484 = vmatprep.mubr.f32.mxu1 %v2699_v5 }
 0x2bc   : > { %1485 = vmatmul.mubr.f32.gmra.mrb[52].mxu1 %v2525_v48 }
 0x2bd   : > { %1490 = vmatprep.mubr.f32.mxu1 %v2699_v5 }
 0x2c0   : > { %1491 = vmatmul.mubr.f32.gmra.mrb[54].mxu1 %v2527_v49 }
 0x2c1   : > { %1496 = vmatprep.mubr.f32.mxu1 %v2699_v5 }
 0x2c4   : > { %1497 = vmatmul.mubr.f32.gmra.mrb[56].mxu1 %v2529_v51 }
 0x2c5   : > { %1502 = vmatprep.mubr.f32.mxu1 %v2699_v5 }
 0x2c8   : > { %1503 = vmatmul.mubr.f32.gmra.mrb[58].mxu1 %v2531_v52 }
 0x2c9   : > { %1508 = vmatprep.mubr.f32.mxu1 %v2699_v5 }
 0x2cc   : > { %1509 = vmatmul.mubr.f32.gmra.mrb[60].mxu1 %v2533_v53 }
 0x2cd   : > { %1514 = vmatprep.mubr.f32.mxu1 %v2699_v5 }
 0x2d0   : > { %1515 = vmatmul.mubr.f32.gmra.mrb[62].mxu1 %v2535_v54 }
 0x367   : > { %v1426_v61 = vpop.f32.mrb[32].mxu1 }
 0x368   : > { %v3283_v62 = vadd.f32 %v1426_v61, %v3278_v59  ;;  %v1428_v63 = vpop.f32.mrb[33].mxu1 }
 0x369   : > { %v3286_v0 = vadd.f32 %v1428_v63, %v3280_v60 }
 0x36b   : > { %v1432_v1 = vpop.f32.mrb[34].mxu1  ;;  %v1521_v6 = vmax.f32 %v3283_v62, %v3286_v0 }
 0x36c   : > { %v3291_v2 = vadd.f32 %v1432_v1, %v3278_v59  ;;  %v1434_v4 = vpop.f32.mrb[35].mxu1 }
 0x36d   : > { %v3294_v5 = vadd.f32 %v1434_v4, %v3280_v60  ;;  %1522 = vmax.xlane.f32.xlu1 %v1521_v6 }
 0x36f   : > { %v1438_v7 = vpop.f32.mrb[36].mxu1  ;;  %v1524_v8 = vmax.f32 %v3291_v2, %v3294_v5 }
 0x370   : > { %v3299_v9 = vadd.f32 %v1438_v7, %v3278_v59  ;;  %v1440_v10 = vpop.f32.mrb[37].mxu1 }
 0x371   : > { %v3302_v3 = vadd.f32 %v1440_v10, %v3280_v60  ;;  %1525 = vmax.xlane.f32.xlu0 %v1524_v8 }
 0x373   : > { %v1444_v11 = vpop.f32.mrb[38].mxu1  ;;  %v1527_v12 = vmax.f32 %v3299_v9, %v3302_v3 }
 0x374   : > { %v3307_v13 = vadd.f32 %v1444_v11, %v3278_v59  ;;  %v1446_v14 = vpop.f32.mrb[39].mxu1 }
 0x375   : > { %v3310_v15 = vadd.f32 %v1446_v14, %v3280_v60  ;;  %1528 = vmax.xlane.f32.xlu0 %v1527_v12 }
 0x377   : > { %v1450_v16 = vpop.f32.mrb[40].mxu1  ;;  %v1530_v17 = vmax.f32 %v3307_v13, %v3310_v15 }
 0x378   : > { %v3315_v18 = vadd.f32 %v1450_v16, %v3278_v59  ;;  %v1452_v19 = vpop.f32.mrb[41].mxu1 }
 0x379   : > { %v3318_v20 = vadd.f32 %v1452_v19, %v3280_v60  ;;  %1531 = vmax.xlane.f32.xlu1 %v1530_v17 }
 0x37b   : > { %v1456_v21 = vpop.f32.mrb[42].mxu1  ;;  %v1533_v22 = vmax.f32 %v3315_v18, %v3318_v20 }
 0x37c   : > { %v3323_v23 = vadd.f32 %v1456_v21, %v3278_v59  ;;  %v1458_v24 = vpop.f32.mrb[43].mxu1 }
 0x37d   : > { %v3326_v25 = vadd.f32 %v1458_v24, %v3280_v60  ;;  %1534 = vmax.xlane.f32.xlu0 %v1533_v22 }
 0x37f   : > { %v1462_v26 = vpop.f32.mrb[44].mxu1  ;;  %v1536_v27 = vmax.f32 %v3323_v23, %v3326_v25 }
 0x380   : > { %v3331_v28 = vadd.f32 %v1462_v26, %v3278_v59  ;;  %v1464_v29 = vpop.f32.mrb[45].mxu1 }
 0x381   : > { %v3334_v30 = vadd.f32 %v1464_v29, %v3280_v60  ;;  %1537 = vmax.xlane.f32.xlu1 %v1536_v27 }
 0x383   : > { %v1468_v31 = vpop.f32.mrb[46].mxu1  ;;  %v1539_v32 = vmax.f32 %v3331_v28, %v3334_v30 }
 0x384   : > { %v3339_v33 = vadd.f32 %v1468_v31, %v3278_v59  ;;  %v1470_v34 = vpop.f32.mrb[47].mxu1 }
 0x385   : > { %v3342_v35 = vadd.f32 %v1470_v34, %v3280_v60  ;;  %1540 = vmax.xlane.f32.xlu0 %v1539_v32 }
 0x387   : > { %v1474_v36 = vpop.f32.mrb[48].mxu1  ;;  %v1542_v37 = vmax.f32 %v3339_v33, %v3342_v35 }
 0x388   : > { %v3347_v38 = vadd.f32 %v1474_v36, %v3278_v59  ;;  %v1476_v39 = vpop.f32.mrb[49].mxu1 }
 0x389   : > { %v3350_v40 = vadd.f32 %v1476_v39, %v3280_v60  ;;  %1543 = vmax.xlane.f32.xlu1 %v1542_v37 }
 0x38b   : > { %v1480_v41 = vpop.f32.mrb[50].mxu1  ;;  %v1545_v42 = vmax.f32 %v3347_v38, %v3350_v40 }
 0x38c   : > { %v3355_v43 = vadd.f32 %v1480_v41, %v3278_v59  ;;  %v1482_v44 = vpop.f32.mrb[51].mxu1 }
 0x38d   : > { %v3358_v45 = vadd.f32 %v1482_v44, %v3280_v60  ;;  %1546 = vmax.xlane.f32.xlu0 %v1545_v42 }
 0x38f   : > { %v1486_v47 = vpop.f32.mrb[52].mxu1  ;;  %v1548_v48 = vmax.f32 %v3355_v43, %v3358_v45 }
 0x390   : > { %v3363_v46 = vadd.f32 %v1486_v47, %v3278_v59  ;;  %v1488_v49 = vpop.f32.mrb[53].mxu1 }
 0x391   : > { %v3366_v50 = vadd.f32 %v1488_v49, %v3280_v60  ;;  %1549 = vmax.xlane.f32.xlu1 %v1548_v48 }
 0x393   : > { %v1492_v51 = vpop.f32.mrb[54].mxu1  ;;  %v1551_v52 = vmax.f32 %v3363_v46, %v3366_v50 }
 0x394   : > { %v3371_v53 = vadd.f32 %v1492_v51, %v3278_v59  ;;  %v1494_v54 = vpop.f32.mrb[55].mxu1 }
 0x395   : > { %v3374_v55 = vadd.f32 %v1494_v54, %v3280_v60  ;;  %1552 = vmax.xlane.f32.xlu0 %v1551_v52 }
 0x397   : > { %v1498_v56 = vpop.f32.mrb[56].mxu1  ;;  %v1554_v57 = vmax.f32 %v3371_v53, %v3374_v55 }
 0x398   : > { %v3379_v58 = vadd.f32 %v1498_v56, %v3278_v59  ;;  %v1500_v61 = vpop.f32.mrb[57].mxu1 }
 0x399   : > { %v3382_v63 = vadd.f32 %v1500_v61, %v3280_v60  ;;  %1555 = vmax.xlane.f32.xlu1 %v1554_v57 }
 0x39b   : > { %v1504_v1 = vpop.f32.mrb[58].mxu1  ;;  %v1557_v6 = vmax.f32 %v3379_v58, %v3382_v63 }
 0x39c   : > { %v3387_v4 = vadd.f32 %v1504_v1, %v3278_v59  ;;  %v1506_v7 = vpop.f32.mrb[59].mxu1 }
 0x39d   : > { %v3390_v8 = vadd.f32 %v1506_v7, %v3280_v60  ;;  %1558 = vmax.xlane.f32.xlu0 %v1557_v6 }
 0x39f   : > { %v1510_v10 = vpop.f32.mrb[60].mxu1  ;;  %v1560_v11 = vmax.f32 %v3387_v4, %v3390_v8 }
 0x3a0   : > { %v3395_v12 = vadd.f32 %v1510_v10, %v3278_v59  ;;  %v1512_v14 = vpop.f32.mrb[61].mxu1 }
 0x3a1   : > { %v3398_v16 = vadd.f32 %v1512_v14, %v3280_v60  ;;  %1561 = vmax.xlane.f32.xlu1 %v1560_v11 }
 0x3a3   : > { %v1516_v17 = vpop.f32.mrb[62].mxu1  ;;  %v1563_v19 = vmax.f32 %v3395_v12, %v3398_v16 }
 0x3a4   : > { %v3403_v21 = vadd.f32 %v1516_v17, %v3278_v59  ;;  %v1518_v22 = vpop.f32.mrb[63].mxu1 }
 0x3a5   : > { %v3406_v24 = vadd.f32 %v1518_v22, %v3280_v60  ;;  %1564 = vmax.xlane.f32.xlu0 %v1563_v19 }
 0x3a7   : > { %v1566_v26 = vmax.f32 %v3403_v21, %v3406_v24 }
 0x3a9   : > { %1567 = vmax.xlane.f32.xlu1 %v1566_v26 }
 0x3fa   : > { %v1523_v27 = vpop.xlane.xlu1 %1522 }
 0x3fb   : > { %v3411_v29 = vsub.f32 %v3283_v62, %v1523_v27  ;;  %v3414_v31 = vsub.f32 %v3286_v0, %v1523_v27 }
 0x3fd   : > { %v1601_v32 = vmul.f32 1.442695, %v3411_v29  ;;  %v1603_v59 = vmul.f32 1.442695, %v3414_v31 }
 0x3fe   : > { %v1526_v34 = vpop.xlane.xlu0 %1525 }
 0x3ff   : > { %2536 = vpow2.f32 %v1601_v32  ;;  %v3419_v60 = vsub.f32 %v3291_v2, %v1526_v34  ;;  %v3422_v36 = vsub.f32 %v3294_v5, %v1526_v34 }
 0x400   : > { %2538 = vpow2.f32 %v1603_v59 }
 0x401   : > { %v1605_v37 = vmul.f32 1.442695, %v3419_v60  ;;  %v1607_v62 = vmul.f32 1.442695, %v3422_v36 }
 0x402   : > { %v1529_v39 = vpop.xlane.xlu0 %1528 }
 0x403   : > { %2540 = vpow2.f32 %v1605_v37  ;;  %v3427_v0 = vsub.f32 %v3299_v9, %v1529_v39  ;;  %v3430_v41 = vsub.f32 %v3302_v3, %v1529_v39 }
 0x404   : > { %2542 = vpow2.f32 %v1607_v62 }
 0x405   : > { %v1609_v2 = vmul.f32 1.442695, %v3427_v0  ;;  %v1611_v42 = vmul.f32 1.442695, %v3430_v41 }
 0x406   : > { %v1532_v5 = vpop.xlane.xlu1 %1531 }
 0x407   : > { %2544 = vpow2.f32 %v1609_v2  ;;  %v3435_v44 = vsub.f32 %v3307_v13, %v1532_v5  ;;  %v3438_v47 = vsub.f32 %v3310_v15, %v1532_v5 }
 0x408   : > { %2546 = vpow2.f32 %v1611_v42 }
 0x409   : > { %v2537_v48 = vpop.eup %2536  ;;  %v1613_v9 = vmul.f32 1.442695, %v3435_v44  ;;  %v1615_v3 = vmul.f32 1.442695, %v3438_v47 }
 0x40a   : > { %v2539_v49 = vpop.eup %2538  ;;  %v1535_v51 = vpop.xlane.xlu0 %1534 }
 0x40b   : > { %2548 = vpow2.f32 %v1613_v9  ;;  %v3443_v52 = vsub.f32 %v3315_v18, %v1535_v51  ;;  %v3446_v54 = vsub.f32 %v3318_v20, %v1535_v51  ;;  %v1665_v13 = vadd.f32 %v2539_v49, %v2537_v48 }
 0x40c   : > { %2550 = vpow2.f32 %v1615_v3 }
 0x40d   : > { %v2541_v56 = vpop.eup %2540  ;;  %v1617_v15 = vmul.f32 1.442695, %v3443_v52  ;;  %v1619_v57 = vmul.f32 1.442695, %v3446_v54  ;;  %1666 = vadd.xlane.f32.xlu0 %v1665_v13 }
 0x40e   : > { %v2543_v61 = vpop.eup %2542  ;;  %v1538_v1 = vpop.xlane.xlu1 %1537 }
 0x40f   : > { %2552 = vpow2.f32 %v1617_v15  ;;  %v3451_v6 = vsub.f32 %v3323_v23, %v1538_v1  ;;  %v3454_v18 = vsub.f32 %v3326_v25, %v1538_v1  ;;  %v1668_v7 = vadd.f32 %v2543_v61, %v2541_v56 }
 0x410   : > { %2554 = vpow2.f32 %v1619_v57 }
 0x411   : > { %v2545_v20 = vpop.eup %2544  ;;  %v1621_v10 = vmul.f32 1.442695, %v3451_v6  ;;  %v1623_v11 = vmul.f32 1.442695, %v3454_v18  ;;  %1669 = vadd.xlane.f32.xlu1 %v1668_v7 }
 0x412   : > { %v2547_v14 = vpop.eup %2546  ;;  %v1541_v17 = vpop.xlane.xlu0 %1540 }
 0x413   : > { %2556 = vpow2.f32 %v1621_v10  ;;  %v3459_v19 = vsub.f32 %v3331_v28, %v1541_v17  ;;  %v3462_v23 = vsub.f32 %v3334_v30, %v1541_v17  ;;  %v1671_v22 = vadd.f32 %v2547_v14, %v2545_v20 }
 0x414   : > { %2558 = vpow2.f32 %v1623_v11 }
 0x415   : > { %v2549_v25 = vpop.eup %2548  ;;  %v1625_v26 = vmul.f32 1.442695, %v3459_v19  ;;  %v1627_v27 = vmul.f32 1.442695, %v3462_v23  ;;  %1672 = vadd.xlane.f32.xlu0 %v1671_v22 }
 0x416   : > { %v2551_v32 = vpop.eup %2550  ;;  %v1544_v59 = vpop.xlane.xlu1 %1543 }
 0x417   : > { %2560 = vpow2.f32 %v1625_v26  ;;  %v3467_v34 = vsub.f32 %v3339_v33, %v1544_v59  ;;  %v3470_v28 = vsub.f32 %v3342_v35, %v1544_v59  ;;  %v1674_v37 = vadd.f32 %v2551_v32, %v2549_v25 }
 0x418   : > { %2562 = vpow2.f32 %v1627_v27 }
 0x419   : > { %v2553_v30 = vpop.eup %2552  ;;  %v1629_v62 = vmul.f32 1.442695, %v3467_v34  ;;  %v1631_v39 = vmul.f32 1.442695, %v3470_v28  ;;  %1675 = vadd.xlane.f32.xlu1 %v1674_v37 }
 0x41a   : > { %v2555_v2 = vpop.eup %2554  ;;  %v1547_v42 = vpop.xlane.xlu0 %1546 }
 0x41b   : > { %2564 = vpow2.f32 %v1629_v62  ;;  %v3475_v5 = vsub.f32 %v3347_v38, %v1547_v42  ;;  %v3478_v33 = vsub.f32 %v3350_v40, %v1547_v42  ;;  %v1677_v48 = vadd.f32 %v2555_v2, %v2553_v30 }
 0x41c   : > { %2566 = vpow2.f32 %v1631_v39 }
 0x41d   : > { %v2557_v35 = vpop.eup %2556  ;;  %v1633_v9 = vmul.f32 1.442695, %v3475_v5  ;;  %v1635_v3 = vmul.f32 1.442695, %v3478_v33  ;;  %1678 = vadd.xlane.f32.xlu0 %v1677_v48 }
 0x41e   : > { %v2559_v49 = vpop.eup %2558  ;;  %v1550_v51 = vpop.xlane.xlu1 %1549 }
 0x41f   : > { %2568 = vpow2.f32 %v1633_v9  ;;  %v3483_v13 = vsub.f32 %v3355_v43, %v1550_v51  ;;  %v3486_v38 = vsub.f32 %v3358_v45, %v1550_v51  ;;  %v1680_v56 = vadd.f32 %v2559_v49, %v2557_v35 }
 0x420   : > { %2570 = vpow2.f32 %v1635_v3 }
 0x421   : > { %v2561_v40 = vpop.eup %2560  ;;  %v1637_v15 = vmul.f32 1.442695, %v3483_v13  ;;  %v1639_v57 = vmul.f32 1.442695, %v3486_v38  ;;  %1681 = vadd.xlane.f32.xlu1 %v1680_v56 }
 0x422   : > { %v2563_v61 = vpop.eup %2562  ;;  %v1553_v1 = vpop.xlane.xlu0 %1552 }
 0x423   : > { %2572 = vpow2.f32 %v1637_v15  ;;  %v3491_v7 = vsub.f32 %v3363_v46, %v1553_v1  ;;  %v3494_v43 = vsub.f32 %v3366_v50, %v1553_v1  ;;  %v1683_v20 = vadd.f32 %v2563_v61, %v2561_v40 }
 0x424   : > { %2574 = vpow2.f32 %v1639_v57 }
 0x425   : > { %v2565_v45 = vpop.eup %2564  ;;  %v1641_v10 = vmul.f32 1.442695, %v3491_v7  ;;  %v1643_v11 = vmul.f32 1.442695, %v3494_v43  ;;  %1684 = vadd.xlane.f32.xlu0 %v1683_v20 }
 0x426   : > { %v2567_v14 = vpop.eup %2566  ;;  %v1556_v17 = vpop.xlane.xlu1 %1555 }
 0x427   : > { %2576 = vpow2.f32 %v1641_v10  ;;  %v3499_v22 = vsub.f32 %v3371_v53, %v1556_v17  ;;  %v3502_v46 = vsub.f32 %v3374_v55, %v1556_v17  ;;  %v1686_v25 = vadd.f32 %v2567_v14, %v2565_v45 }
 0x428   : > { %2578 = vpow2.f32 %v1643_v11 }
 0x429   : > { %v2569_v50 = vpop.eup %2568  ;;  %v1645_v26 = vmul.f32 1.442695, %v3499_v22  ;;  %v1647_v27 = vmul.f32 1.442695, %v3502_v46  ;;  %1687 = vadd.xlane.f32.xlu1 %v1686_v25 }
 0x42a   : > { %v2571_v32 = vpop.eup %2570  ;;  %v1559_v59 = vpop.xlane.xlu0 %1558 }
 0x42b   : > { %2580 = vpow2.f32 %v1645_v26  ;;  %v3507_v37 = vsub.f32 %v3379_v58, %v1559_v59  ;;  %v3510_v53 = vsub.f32 %v3382_v63, %v1559_v59  ;;  %v1689_v30 = vadd.f32 %v2571_v32, %v2569_v50 }
 0x42c   : > { %2582 = vpow2.f32 %v1647_v27 }
 0x42d   : > { %v2573_v55 = vpop.eup %2572  ;;  %v1649_v62 = vmul.f32 1.442695, %v3507_v37  ;;  %v1651_v39 = vmul.f32 1.442695, %v3510_v53  ;;  %1690 = vadd.xlane.f32.xlu0 %v1689_v30 }
 0x42e   : > { %v2575_v2 = vpop.eup %2574  ;;  %v1562_v42 = vpop.xlane.xlu1 %1561 }
 0x42f   : > { %2584 = vpow2.f32 %v1649_v62  ;;  %v3515_v48 = vsub.f32 %v3387_v4, %v1562_v42  ;;  %v3518_v58 = vsub.f32 %v3390_v8, %v1562_v42  ;;  %v1692_v35 = vadd.f32 %v2575_v2, %v2573_v55 }
 0x430   : > { %2586 = vpow2.f32 %v1651_v39 }
 0x431   : > { %v2577_v63 = vpop.eup %2576  ;;  %v1653_v9 = vmul.f32 1.442695, %v3515_v48  ;;  %v1655_v3 = vmul.f32 1.442695, %v3518_v58  ;;  %1693 = vadd.xlane.f32.xlu1 %v1692_v35 }
 0x432   : > { %v2579_v49 = vpop.eup %2578  ;;  %v1565_v51 = vpop.xlane.xlu0 %1564 }
 0x433   : > { %2588 = vpow2.f32 %v1653_v9  ;;  %v3523_v56 = vsub.f32 %v3395_v12, %v1565_v51  ;;  %v3526_v4 = vsub.f32 %v3398_v16, %v1565_v51  ;;  %v1695_v40 = vadd.f32 %v2579_v49, %v2577_v63 }
 0x434   : > { %2590 = vpow2.f32 %v1655_v3 }
 0x435   : > { %v2581_v8 = vpop.eup %2580  ;;  %v1657_v15 = vmul.f32 1.442695, %v3523_v56  ;;  %v1659_v57 = vmul.f32 1.442695, %v3526_v4  ;;  %1696 = vadd.xlane.f32.xlu0 %v1695_v40 }
 0x436   : > { %v2583_v61 = vpop.eup %2582  ;;  %v1568_v1 = vpop.xlane.xlu1 %1567 }
 0x437   : > { %2592 = vpow2.f32 %v1657_v15  ;;  %v3531_v20 = vsub.f32 %v3403_v21, %v1568_v1  ;;  %v3534_v12 = vsub.f32 %v3406_v24, %v1568_v1  ;;  %v1698_v45 = vadd.f32 %v2583_v61, %v2581_v8 }
 0x438   : > { %2594 = vpow2.f32 %v1659_v57 }
 0x439   : > { %v2585_v16 = vpop.eup %2584  ;;  %v1661_v10 = vmul.f32 1.442695, %v3531_v20  ;;  %v1663_v11 = vmul.f32 1.442695, %v3534_v12  ;;  %1699 = vadd.xlane.f32.xlu1 %v1698_v45 }
 0x43a   : > { %v2587_v14 = vpop.eup %2586 }
 0x43b   : > { %2596 = vpow2.f32 %v1661_v10  ;;  %v1701_v17 = vadd.f32 %v2587_v14, %v2585_v16 }
 0x43c   : > { %2598 = vpow2.f32 %v1663_v11 }
 0x43d   : > { %v2589_v25 = vpop.eup %2588  ;;  %1702 = vadd.xlane.f32.xlu0 %v1701_v17 }
 0x43e   : > { %v2591_v21 = vpop.eup %2590 }
 0x43f   : > { %v1704_v50 = vadd.f32 %v2591_v21, %v2589_v25 }
 0x441   : > { %v2593_v26 = vpop.eup %2592  ;;  %1705 = vadd.xlane.f32.xlu1 %v1704_v50 }
 0x442   : > { %v2595_v24 = vpop.eup %2594 }
 0x443   : > { %v1707_v27 = vadd.f32 %v2595_v24, %v2593_v26 }
 0x445   : > { %v2597_v32 = vpop.eup %2596  ;;  %1708 = vadd.xlane.f32.xlu0 %v1707_v27 }
 0x446   : > { %v2599_v59 = vpop.eup %2598 }
 0x447   : > { %v1710_v30 = vadd.f32 %v2599_v59, %v2597_v32 }
 0x449   : > { %1711 = vadd.xlane.f32.xlu1 %v1710_v30 }
 0x49a   : > { %v1667_v55 = vpop.xlane.xlu0 %1666 }
 0x49b   : > { %2600 = vlog2.f32 %v1667_v55 }
 0x49e   : > { %v1670_v62 = vpop.xlane.xlu1 %1669 }
 0x49f   : > { %2602 = vlog2.f32 %v1670_v62 }
 0x4a2   : > { %v1673_v39 = vpop.xlane.xlu0 %1672 }
 0x4a3   : > { %2604 = vlog2.f32 %v1673_v39 }
 0x4a5   : > { %v2601_v2 = vpop.eup %2600 }
 0x4a6   : > { %v1714_v42 = vmul.f32 0.6931472, %v2601_v2  ;;  %v1676_v35 = vpop.xlane.xlu1 %1675 }
 0x4a7   : > { %2606 = vlog2.f32 %v1676_v35 }
 0x4a8   : > { %v1745_v63 = vsub.f32 %v3411_v29, %v1714_v42  ;;  %v1746_v9 = vsub.f32 %v3414_v31, %v1714_v42 }
 0x4a9   : > { %v2603_v3 = vpop.eup %2602 }
 0x4aa   : > { %1777 = vst [vmem:[%s3543_s17] sm:$0xff] %v1745_v63  ;;  %1778 = vst [vmem:[%s3543_s17 + $0x8] sm:$0xff] %v1746_v9  ;;  %v1716_v49 = vmul.f32 0.6931472, %v2603_v3  ;;  %v1679_v51 = vpop.xlane.xlu0 %1678 }
 0x4ab   : > { %2608 = vlog2.f32 %v1679_v51 }
 0x4ac   : > { %v1747_v40 = vsub.f32 %v3419_v60, %v1716_v49  ;;  %v1748_v29 = vsub.f32 %v3422_v36, %v1716_v49 }
 0x4ad   : > { %v2605_v8 = vpop.eup %2604 }
 0x4ae   : > { %1779 = vst [vmem:[%s3543_s17 + $0x10] sm:$0xff] %v1747_v40  ;;  %1780 = vst [vmem:[%s3543_s17 + $0x18] sm:$0xff] %v1748_v29  ;;  %v1718_v31 = vmul.f32 0.6931472, %v2605_v8  ;;  %v1682_v15 = vpop.xlane.xlu1 %1681 }
 0x4af   : > { %2610 = vlog2.f32 %v1682_v15 }
 0x4b0   : > { %v1749_v57 = vsub.f32 %v3427_v0, %v1718_v31  ;;  %v1750_v61 = vsub.f32 %v3430_v41, %v1718_v31 }
 0x4b1   : > { %v2607_v1 = vpop.eup %2606 }
 0x4b2   : > { %1781 = vst [vmem:[%s3543_s17 + $0x20] sm:$0xff] %v1749_v57  ;;  %1782 = vst [vmem:[%s3543_s17 + $0x28] sm:$0xff] %v1750_v61  ;;  %v1720_v60 = vmul.f32 0.6931472, %v2607_v1  ;;  %v1685_v45 = vpop.xlane.xlu0 %1684 }
 0x4b3   : > { %2612 = vlog2.f32 %v1685_v45 }
 0x4b4   : > { %v1751_v36 = vsub.f32 %v3435_v44, %v1720_v60  ;;  %v1752_v16 = vsub.f32 %v3438_v47, %v1720_v60 }
 0x4b5   : > { %v2609_v10 = vpop.eup %2608 }
 0x4b6   : > { %1783 = vst [vmem:[%s3543_s17 + $0x30] sm:$0xff] %v1751_v36  ;;  %1784 = vst [vmem:[%s3543_s17 + $0x38] sm:$0xff] %v1752_v16  ;;  %v1722_v0 = vmul.f32 0.6931472, %v2609_v10  ;;  %v1688_v11 = vpop.xlane.xlu1 %1687 }
 0x4b7   : > { %2614 = vlog2.f32 %v1688_v11 }
 0x4b8   : > { %v1753_v41 = vsub.f32 %v3443_v52, %v1722_v0  ;;  %v1754_v14 = vsub.f32 %v3446_v54, %v1722_v0 }
 0x4b9   : > { %v2611_v17 = vpop.eup %2610 }
 0x4ba   : > { %1785 = vst [vmem:[%s3543_s17 + $0x40] sm:$0xff] %v1753_v41  ;;  %1786 = vst [vmem:[%s3543_s17 + $0x48] sm:$0xff] %v1754_v14  ;;  %v1724_v44 = vmul.f32 0.6931472, %v2611_v17  ;;  %v1691_v25 = vpop.xlane.xlu0 %1690 }
 0x4bb   : > { %2616 = vlog2.f32 %v1691_v25 }
 0x4bc   : > { %v1755_v47 = vsub.f32 %v3451_v6, %v1724_v44  ;;  %v1756_v21 = vsub.f32 %v3454_v18, %v1724_v44 }
 0x4bd   : > { %v2613_v50 = vpop.eup %2612 }
 0x4be   : > { %1787 = vst [vmem:[%s3543_s17 + $0x50] sm:$0xff] %v1755_v47  ;;  %1788 = vst [vmem:[%s3543_s17 + $0x58] sm:$0xff] %v1756_v21  ;;  %v1726_v52 = vmul.f32 0.6931472, %v2613_v50  ;;  %v1694_v26 = vpop.xlane.xlu1 %1693 }
 0x4bf   : > { %2618 = vlog2.f32 %v1694_v26 }
 0x4c0   : > { %v1757_v54 = vsub.f32 %v3459_v19, %v1726_v52  ;;  %v1758_v24 = vsub.f32 %v3462_v23, %v1726_v52 }
 0x4c1   : > { %v2615_v27 = vpop.eup %2614 }
 0x4c2   : > { %1789 = vst [vmem:[%s3543_s17 + $0x60] sm:$0xff] %v1757_v54  ;;  %1790 = vst [vmem:[%s3543_s17 + $0x68] sm:$0xff] %v1758_v24  ;;  %v1728_v6 = vmul.f32 0.6931472, %v2615_v27  ;;  %v1697_v32 = vpop.xlane.xlu0 %1696 }
 0x4c3   : > { %2620 = vlog2.f32 %v1697_v32 }
 0x4c4   : > { %v1759_v18 = vsub.f32 %v3467_v34, %v1728_v6  ;;  %v1760_v59 = vsub.f32 %v3470_v28, %v1728_v6 }
 0x4c5   : > { %v2617_v30 = vpop.eup %2616 }
 0x4c6   : > { %1791 = vst [vmem:[%s3543_s17 + $0x70] sm:$0xff] %v1759_v18  ;;  %1792 = vst [vmem:[%s3543_s17 + $0x78] sm:$0xff] %v1760_v59  ;;  %v1730_v19 = vmul.f32 0.6931472, %v2617_v30  ;;  %v1700_v55 = vpop.xlane.xlu1 %1699 }
 0x4c7   : > { %2622 = vlog2.f32 %v1700_v55 }
 0x4c8   : > { %v1761_v23 = vsub.f32 %v3475_v5, %v1730_v19  ;;  %v1762_v62 = vsub.f32 %v3478_v33, %v1730_v19 }
 0x4c9   : > { %v2619_v39 = vpop.eup %2618 }
 0x4ca   : > { %1793 = vst [vmem:[%s3543_s17 + $0x80] sm:$0xff] %v1761_v23  ;;  %1794 = vst [vmem:[%s3543_s17 + $0x88] sm:$0xff] %v1762_v62  ;;  %v1732_v34 = vmul.f32 0.6931472, %v2619_v39  ;;  %v1703_v2 = vpop.xlane.xlu0 %1702 }
 0x4cb   : > { %2624 = vlog2.f32 %v1703_v2 }
 0x4cc   : > { %v1763_v28 = vsub.f32 %v3483_v13, %v1732_v34  ;;  %v1764_v42 = vsub.f32 %v3486_v38, %v1732_v34 }
 0x4cd   : > { %v2621_v35 = vpop.eup %2620 }
 0x4ce   : > { %1795 = vst [vmem:[%s3543_s17 + $0x90] sm:$0xff] %v1763_v28  ;;  %1796 = vst [vmem:[%s3543_s17 + $0x98] sm:$0xff] %v1764_v42  ;;  %v1734_v5 = vmul.f32 0.6931472, %v2621_v35  ;;  %v1706_v63 = vpop.xlane.xlu1 %1705 }
 0x4cf   : > { %2626 = vlog2.f32 %v1706_v63 }
 0x4d0   : > { %v1765_v33 = vsub.f32 %v3491_v7, %v1734_v5  ;;  %v1766_v9 = vsub.f32 %v3494_v43, %v1734_v5 }
 0x4d1   : > { %v2623_v3 = vpop.eup %2622 }
 0x4d2   : > { %1797 = vst [vmem:[%s3543_s17 + $0xa0] sm:$0xff] %v1765_v33  ;;  %1798 = vst [vmem:[%s3543_s17 + $0xa8] sm:$0xff] %v1766_v9  ;;  %v1736_v13 = vmul.f32 0.6931472, %v2623_v3  ;;  %v1709_v49 = vpop.xlane.xlu0 %1708 }
 0x4d3   : > { %2628 = vlog2.f32 %v1709_v49 }
 0x4d4   : > { %v1767_v38 = vsub.f32 %v3499_v22, %v1736_v13  ;;  %v1768_v51 = vsub.f32 %v3502_v46, %v1736_v13 }
 0x4d5   : > { %v2625_v40 = vpop.eup %2624 }
 0x4d6   : > { %1799 = vst [vmem:[%s3543_s17 + $0xb0] sm:$0xff] %v1767_v38  ;;  %1800 = vst [vmem:[%s3543_s17 + $0xb8] sm:$0xff] %v1768_v51  ;;  %v1738_v7 = vmul.f32 0.6931472, %v2625_v40  ;;  %v1712_v29 = vpop.xlane.xlu1 %1711 }
 0x4d7   : > { %2630 = vlog2.f32 %v1712_v29 }
 0x4d8   : > { %v1769_v43 = vsub.f32 %v3507_v37, %v1738_v7  ;;  %v1770_v8 = vsub.f32 %v3510_v53, %v1738_v7 }
 0x4d9   : > { %v2627_v31 = vpop.eup %2626 }
 0x4da   : > { %1801 = vst [vmem:[%s3543_s17 + $0xc0] sm:$0xff] %v1769_v43  ;;  %1802 = vst [vmem:[%s3543_s17 + $0xc8] sm:$0xff] %v1770_v8  ;;  %v1740_v22 = vmul.f32 0.6931472, %v2627_v31 }
 0x4dc   : > { %v1771_v46 = vsub.f32 %v3515_v48, %v1740_v22  ;;  %v1772_v15 = vsub.f32 %v3518_v58, %v1740_v22 }
 0x4dd   : > { %v2629_v57 = vpop.eup %2628 }
 0x4de   : > { %1803 = vst [vmem:[%s3543_s17 + $0xd0] sm:$0xff] %v1771_v46  ;;  %1804 = vst [vmem:[%s3543_s17 + $0xd8] sm:$0xff] %v1772_v15  ;;  %v1742_v61 = vmul.f32 0.6931472, %v2629_v57 }
 0x4e0   : > { %v1773_v37 = vsub.f32 %v3523_v56, %v1742_v61  ;;  %v1774_v53 = vsub.f32 %v3526_v4, %v1742_v61 }
 0x4e1   : > { %v2631_v1 = vpop.eup %2630 }
 0x4e2   : > { %1805 = vst [vmem:[%s3543_s17 + $0xe0] sm:$0xff] %v1773_v37  ;;  %1806 = vst [vmem:[%s3543_s17 + $0xe8] sm:$0xff] %v1774_v53  ;;  %v1744_v48 = vmul.f32 0.6931472, %v2631_v1 }
 0x4e4   : > { %v1775_v58 = vsub.f32 %v3531_v20, %v1744_v48  ;;  %v1776_v56 = vsub.f32 %v3534_v12, %v1744_v48 }
 0x4e6   : > { %1807 = vst [vmem:[%s3543_s17 + $0xf0] sm:$0xff] %v1775_v58  ;;  %1808 = vst [vmem:[%s3543_s17 + $0xf8] sm:$0xff] %v1776_v56 }
 0x4e7   : > { %2645 = shalt.err (!%p2642_p3)
}
 0x4e8   : > { %s2646_s12 = scalar_lea.hbm %s3608_s28, 4096  ;;  %s2650_s15 = scalar_lea.hbm %s3665_s6, 8192 }
 0x4e9   : > { %p2647_p4 = scmp.ne.s32.totalorder %s3608_s28, %s2646_s12  ;;  %p2651_p9 = scmp.lt.u32.totalorder %s3608_s28, %s3665_s6 }
 0x4ea   : > { %p2652_p10 = scmp.lt.u32.totalorder %s2650_s15, %s2646_s12  ;;  %p2654_p12 = scmp.lt.u32.totalorder %s2646_s12, %s3608_s28 }
 0x4eb   : > { %p2648_p7 = pnand %p2647_p4, %p2776_p5 }
 0x4ec   : > { %p2653_p11 = por %p2652_p10, %p2651_p9 }
 0x4ed   : > { %p2649_p8 = pneg %p2648_p7 }
 0x4ee   : > { %p2655_p13 = por %p2654_p12, %p2653_p11 }
 0x4f0   : > { %p2656_p0 = pnand %p2655_p13, %p2649_p8 }
 0x4f2   : > { %2659 = shalt.err (!%p2656_p0)
}
 0x4f3   : > { %s2701_s18 = smov 256   ;;  %s2702_s26 = smov 16  }
 0x4f4   : > { %2454 = dma.vmem_to_hbm [thread:$0]  (%p2776_p5), %s3610_s20, 4096, %s3608_s28, %s3618_s25, %s2701_s18, %s2701_s18, %s2702_s26  }
 0x4f5 PF: > { %p2460_p1 = scmp.ge.s32.totalorder %s2694_s24, 2  ;;  %s1839_s19 = sand.u32 1, %s2682_s21  }
 0x4f6   : > { %s1840_s29 = scalar_lea.sflag [#allocation3], %s1839_s19 }
 0x4f7   : > { %p2457_p2 = pnand %p2460_p1, %p2780_p6 }
 0x4f9   : > { %2677 = dma.done.wait (!%p2457_p2), %s1840_s29, 4096  }
 0x4fa   : > { %2679 = vsyncadd (!%p2457_p2), %s1840_s29, 4294963200  ;;  %p16_p3 = scmp.ge.s32.totalorder %s2763_s27, 4   ;;  %s3668_s21 = smov %s2686_s22 }
 0x4fb   : > { %s3669_s22 = smov %s2690_s23  ;;  %s3670_s23 = smov %s2774_s30 }
 0x4fc   : > { %s3671_s24 = smov %s2763_s27  ;;  %18 = sbr.rel (!%p16_p3) target bundleno = 3 (0x3), region = 79 }
 0x503   :  { %1845 = vsyncpa [#allocation3], 1 }
 0x504   :  { %1847 = vsyncpa [#allocation3 + $0x1], 1 }

</bundles_post_ra>
